<compile_context>
chip_gen: v6e
topology: v6e:2x2x1
jax: 0.10.0
libtpu: 0.0.40
codegen_flags: <defaults>
</compile_context>

<pallas_src>
import jax
import jax.numpy as jnp
from jax.experimental import pallas as pl
from jax.experimental.pallas import tpu as pltpu


def _conv_prelu_kernel(x_ref, w_ref, b_ref, alpha_ref, o_ref):
    # x_ref:     (1, H+2, W+2, Cin)  whole padded image (VMEM-resident across
    #                                the row-tile grid axis; its block index
    #                                only changes with the batch axis)
    # w_ref:     (9*Cin, Cout)       conv weights, taps flattened into K
    # b_ref:     (1, Cout)           conv bias (f32)
    # alpha_ref: (1,) in SMEM        PReLU slope (single shared parameter)
    # o_ref:     (1, TH, W, Cout)    conv+PReLU output slab (pre-pixel-shuffle)
    TH, W, Cout = o_ref.shape[1], o_ref.shape[2], o_ref.shape[3]
    Cin = x_ref.shape[3]

    t = pl.program_id(1)
    row0 = pl.multiple_of(t * TH, TH)        # first padded input row of slab

    # Build the im2col patch matrix (TH*W, 9*Cin): column block (dy*3+dx) is
    # the input shifted by (dy, dx).  Only sublane-level dynamic slices of the
    # resident image are needed (dx slices are static); everything feeds a
    # single MXU matmul.
    parts = []
    for dy in range(3):
        rows = x_ref[0, pl.ds(row0 + dy, TH), :, :]           # (TH, W+2, Cin)
        for dx in range(3):
            parts.append(rows[:, dx:dx + W, :].reshape(TH * W, Cin))
    patches = jnp.concatenate(parts, axis=1)                  # (TH*W, 9*Cin)

    # One matmul: M=TH*W, K=9*Cin, N=Cout (lane-dense when Cout % 128 == 0).
    acc = jnp.dot(patches, w_ref[...], preferred_element_type=jnp.float32)
    acc = acc + b_ref[...]                                    # (1, Cout) bcast

    alpha = alpha_ref[0]
    y = jnp.where(acc > 0, acc, alpha * acc)                  # shared-alpha PReLU
    o_ref[...] = y.reshape(1, TH, W, Cout).astype(o_ref.dtype)


def deconv_block(x_nchw, weight_oihw, bias, alpha, upscale_factor=2,
                 row_tile=8, compute_dtype=None):
    """Forward pass of DeconvBlock.  x_nchw: (B, n, H, W)."""
    B, Cin, H, W = x_nchw.shape
    Cout = weight_oihw.shape[0]
    r = upscale_factor
    C = Cout // (r * r)
    TH = row_tile if (H % row_tile == 0) else H
    dt = compute_dtype if compute_dtype is not None else x_nchw.dtype

    # Layout prep: one fused XLA pass over the *small* input tensor.
    # NCHW -> NHWC and zero-pad by 1 (conv "same" padding).
    x_nhwc = jnp.transpose(x_nchw, (0, 2, 3, 1))
    x_pad = jnp.pad(x_nhwc, ((0, 0), (1, 1), (1, 1), (0, 0))).astype(dt)

    # OIHW -> (ky, kx, Cin, Cout) -> (9*Cin, Cout); matches patch column order.
    w2 = jnp.transpose(weight_oihw, (2, 3, 1, 0)).reshape(9 * Cin, Cout)
    w2 = w2.astype(dt)
    b2 = bias.reshape(1, Cout).astype(jnp.float32)
    alpha1 = jnp.reshape(alpha, (1,)).astype(jnp.float32)

    conv_nhwc = pl.pallas_call(
        _conv_prelu_kernel,
        out_shape=jax.ShapeDtypeStruct((B, H, W, Cout), jnp.float32),
        grid=(B, H // TH),
        in_specs=[
            # Whole padded image; index constant over the row-tile axis =>
            # fetched once per image and kept resident in VMEM.
            pl.BlockSpec((1, H + 2, W + 2, Cin), lambda b, t: (b, 0, 0, 0)),
            pl.BlockSpec((9 * Cin, Cout), lambda b, t: (0, 0)),
            pl.BlockSpec((1, Cout), lambda b, t: (0, 0)),
            pl.BlockSpec(memory_space=pltpu.MemorySpace.SMEM),
        ],
        out_specs=pl.BlockSpec((1, TH, W, Cout), lambda b, t: (b, t, 0, 0)),
        compiler_params=pltpu.CompilerParams(
            dimension_semantics=("parallel", "parallel")),
    )(x_pad, w2, b2, alpha1)

    # PixelShuffle(r) + NHWC -> NCHW as ONE transpose (the reshapes are free):
    # out[b, c, h*r+i, w*r+j] = conv_nhwc[b, h, w, c*r*r + i*r + j]
    # TODO(synk): writing the shuffled NCHW layout directly from the kernel
    # would need an in-kernel channel->lane transpose and a (W*r)-wide masked
    # store (last dim < 128); kept as a single fused XLA transpose instead.
    y = conv_nhwc.reshape(B, H, W, C, r, r)
    y = jnp.transpose(y, (0, 3, 1, 4, 2, 5))          # (B, C, H, r, W, r)
    y = y.reshape(B, C, H * r, W * r)
    return y


def _reference(x, w, b, alpha, r=2):
    """Pure-JAX reference matching the PyTorch module semantics."""
    y = jax.lax.conv_general_dilated(
        x, w, window_strides=(1, 1), padding=((1, 1), (1, 1)),
        dimension_numbers=("NCHW", "OIHW", "NCHW"))
    y = y + b.reshape(1, -1, 1, 1)
    B, C4, H, W = y.shape
    C = C4 // (r * r)
    y = y.reshape(B, C, r, r, H, W).transpose(0, 1, 4, 2, 5, 3)
    y = y.reshape(B, C, H * r, W * r)
    return jnp.where(y > 0, y, alpha * y)


if __name__ == "__main__":
    # Small-but-lane-friendly shapes consistent with the module: n channels in,
    # 4n out (n=32 -> Cout=128 keeps the matmul N dim and the output stores
    # lane-dense), 3x3 conv, upscale factor 2.
    B, n, H, W = 2, 32, 16, 16
    f, r = 3, 2
    Cout = n * r * r

    key = jax.random.PRNGKey(0)
    kx, kw, kb = jax.random.split(key, 3)

    x = jax.random.normal(kx, (B, n, H, W), dtype=jnp.float32)

    # kaiming_normal (fan_in, gain=sqrt(2)) on the conv weight (OIHW)
    fan_in = n * f * f
    std = (2.0 / fan_in) ** 0.5
    weight = std * jax.random.normal(kw, (Cout, n, f, f), dtype=jnp.float32)
    # Conv2d default bias init: U(-1/sqrt(fan_in), 1/sqrt(fan_in))
    bound = 1.0 / (fan_in ** 0.5)
    bias = jax.random.uniform(kb, (Cout,), minval=-bound, maxval=bound,
                              dtype=jnp.float32)
    # PReLU default single parameter init = 0.25
    alpha = jnp.float32(0.25)

    ref = jax.block_until_ready(_reference(x, weight, bias, alpha, r))

    # f32 path: tight check against the XLA reference.
    out = jax.block_until_ready(deconv_block(x, weight, bias, alpha, r))
    assert out.shape == (B, n, H * r, W * r), out.shape
    max_err = float(jnp.max(jnp.abs(out - ref)))
    assert max_err < 5e-4, f"f32 mismatch vs reference, max abs err = {max_err}"

    # bf16-operand path (recommended on v6e/v7x for MXU throughput); f32
    # accumulation in-kernel, so only operand-rounding error remains.
    out_bf16 = jax.block_until_ready(
        deconv_block(x, weight, bias, alpha, r, compute_dtype=jnp.bfloat16))
    max_err_bf16 = float(jnp.max(jnp.abs(out_bf16 - ref)))
    assert max_err_bf16 < 2e-1, f"bf16 sanity check failed, err = {max_err_bf16}"

    print("KERNEL_OK")
</pallas_src>

<mosaic_0001>
module attributes {stable_mosaic.version = 11 : i64} {
  func.func @_conv_prelu_kernel(%arg0: i32, %arg1: i32, %arg2: memref<1x18x18x32xf32, #tpu.memory_space<vmem>>, %arg3: memref<288x128xf32, #tpu.memory_space<vmem>>, %arg4: memref<1x128xf32, #tpu.memory_space<vmem>>, %arg5: memref<1xf32, #tpu.memory_space<smem>>, %arg6: memref<1x8x16x128xf32, #tpu.memory_space<vmem>>) attributes {dimension_semantics = [#tpu.dimension_semantics<parallel>, #tpu.dimension_semantics<parallel>], iteration_bounds = array<i64: 2, 2>, scalar_prefetch = 0 : i64, scratch_operands = 0 : i64, tpu.core_type = #tpu.core_type<tc>, window_params = [{transform_indices = @transform_0, window_bounds = array<i64: 1, 18, 18, 32>}, {pipeline_mode = #tpu.pipeline_mode<synchronous>, transform_indices = @transform_1, window_bounds = array<i64: 288, 128>}, {pipeline_mode = #tpu.pipeline_mode<synchronous>, transform_indices = @transform_2, window_bounds = array<i64: 1, 128>}, {transform_indices = @transform_3, window_bounds = array<i64: 1>}, {transform_indices = @transform_4, window_bounds = array<i64: 1, 8, 16, 128>}]} {
    %c8_i32 = arith.constant 8 : i32
    %0 = arith.muli %arg1, %c8_i32 : i32
    %1 = tpu.assume_multiple %0, 8 : i32
    %c0_i32 = arith.constant 0 : i32
    %2 = arith.addi %1, %c0_i32 : i32
    %c0 = arith.constant 0 : index
    %3 = arith.index_cast %2 : i32 to index
    %c0_0 = arith.constant 0 : index
    %c0_1 = arith.constant 0 : index
    %4 = vector.load %arg2[%c0, %3, %c0_0, %c0_1] : memref<1x18x18x32xf32, #tpu.memory_space<vmem>>, vector<1x8x18x32xf32>
    %5 = vector.shape_cast %4 : vector<1x8x18x32xf32> to vector<8x18x32xf32>
    %6 = vector.extract_strided_slice %5 {offsets = [0, 0, 0], sizes = [8, 16, 32], strides = [1, 1, 1]} : vector<8x18x32xf32> to vector<8x16x32xf32>
    %7 = vector.shape_cast %6 : vector<8x16x32xf32> to vector<128x32xf32>
    %8 = vector.extract_strided_slice %5 {offsets = [0, 1, 0], sizes = [8, 16, 32], strides = [1, 1, 1]} : vector<8x18x32xf32> to vector<8x16x32xf32>
    %9 = vector.shape_cast %8 : vector<8x16x32xf32> to vector<128x32xf32>
    %10 = vector.extract_strided_slice %5 {offsets = [0, 2, 0], sizes = [8, 16, 32], strides = [1, 1, 1]} : vector<8x18x32xf32> to vector<8x16x32xf32>
    %11 = vector.shape_cast %10 : vector<8x16x32xf32> to vector<128x32xf32>
    %c1_i32 = arith.constant 1 : i32
    %12 = arith.addi %1, %c1_i32 : i32
    %c0_2 = arith.constant 0 : index
    %13 = arith.index_cast %12 : i32 to index
    %c0_3 = arith.constant 0 : index
    %c0_4 = arith.constant 0 : index
    %14 = vector.load %arg2[%c0_2, %13, %c0_3, %c0_4] : memref<1x18x18x32xf32, #tpu.memory_space<vmem>>, vector<1x8x18x32xf32>
    %15 = vector.shape_cast %14 : vector<1x8x18x32xf32> to vector<8x18x32xf32>
    %16 = vector.extract_strided_slice %15 {offsets = [0, 0, 0], sizes = [8, 16, 32], strides = [1, 1, 1]} : vector<8x18x32xf32> to vector<8x16x32xf32>
    %17 = vector.shape_cast %16 : vector<8x16x32xf32> to vector<128x32xf32>
    %18 = vector.extract_strided_slice %15 {offsets = [0, 1, 0], sizes = [8, 16, 32], strides = [1, 1, 1]} : vector<8x18x32xf32> to vector<8x16x32xf32>
    %19 = vector.shape_cast %18 : vector<8x16x32xf32> to vector<128x32xf32>
    %20 = vector.extract_strided_slice %15 {offsets = [0, 2, 0], sizes = [8, 16, 32], strides = [1, 1, 1]} : vector<8x18x32xf32> to vector<8x16x32xf32>
    %21 = vector.shape_cast %20 : vector<8x16x32xf32> to vector<128x32xf32>
    %c2_i32 = arith.constant 2 : i32
    %22 = arith.addi %1, %c2_i32 : i32
    %c0_5 = arith.constant 0 : index
    %23 = arith.index_cast %22 : i32 to index
    %c0_6 = arith.constant 0 : index
    %c0_7 = arith.constant 0 : index
    %24 = vector.load %arg2[%c0_5, %23, %c0_6, %c0_7] : memref<1x18x18x32xf32, #tpu.memory_space<vmem>>, vector<1x8x18x32xf32>
    %25 = vector.shape_cast %24 : vector<1x8x18x32xf32> to vector<8x18x32xf32>
    %26 = vector.extract_strided_slice %25 {offsets = [0, 0, 0], sizes = [8, 16, 32], strides = [1, 1, 1]} : vector<8x18x32xf32> to vector<8x16x32xf32>
    %27 = vector.shape_cast %26 : vector<8x16x32xf32> to vector<128x32xf32>
    %28 = vector.extract_strided_slice %25 {offsets = [0, 1, 0], sizes = [8, 16, 32], strides = [1, 1, 1]} : vector<8x18x32xf32> to vector<8x16x32xf32>
    %29 = vector.shape_cast %28 : vector<8x16x32xf32> to vector<128x32xf32>
    %30 = vector.extract_strided_slice %25 {offsets = [0, 2, 0], sizes = [8, 16, 32], strides = [1, 1, 1]} : vector<8x18x32xf32> to vector<8x16x32xf32>
    %31 = vector.shape_cast %30 : vector<8x16x32xf32> to vector<128x32xf32>
    %32 = tpu.concatenate %7, %9, %11, %17, %19, %21, %27, %29, %31 in 1 : vector<128x32xf32>, vector<128x32xf32>, vector<128x32xf32>, vector<128x32xf32>, vector<128x32xf32>, vector<128x32xf32>, vector<128x32xf32>, vector<128x32xf32>, vector<128x32xf32> -> vector<128x288xf32>
    %c0_8 = arith.constant 0 : index
    %c0_9 = arith.constant 0 : index
    %33 = vector.load %arg3[%c0_8, %c0_9] : memref<288x128xf32, #tpu.memory_space<vmem>>, vector<288x128xf32>
    %cst = arith.constant dense<0.000000e+00> : vector<128x128xf32>
    %34 = tpu.matmul %32, %33, %cst {dimension_numbers = #tpu.dot_dimension_numbers<[1], [0], [0], [1], [0, 0, 1, 1], [], []>} : vector<128x288xf32>, vector<288x128xf32>, vector<128x128xf32> -> vector<128x128xf32>
    %c0_10 = arith.constant 0 : index
    %c0_11 = arith.constant 0 : index
    %35 = vector.load %arg4[%c0_10, %c0_11] : memref<1x128xf32, #tpu.memory_space<vmem>>, vector<1x128xf32>
    %36 = vector.broadcast %35 : vector<1x128xf32> to vector<128x128xf32>
    %37 = arith.addf %34, %36 : vector<128x128xf32>
    %c0_12 = arith.constant 0 : index
    %38 = memref.load %arg5[%c0_12] : memref<1xf32, #tpu.memory_space<smem>>
    %cst_13 = arith.constant 0.000000e+00 : f32
    %39 = vector.broadcast %cst_13 : f32 to vector<128x128xf32>
    %40 = arith.cmpf ogt, %37, %39 : vector<128x128xf32>
    %41 = vector.broadcast %38 : f32 to vector<128x128xf32>
    %42 = arith.mulf %41, %37 : vector<128x128xf32>
    %43 = arith.select %40, %37, %42 : vector<128x128xi1>, vector<128x128xf32>
    %44 = vector.shape_cast %43 : vector<128x128xf32> to vector<1x8x16x128xf32>
    %c0_14 = arith.constant 0 : index
    %c0_15 = arith.constant 0 : index
    %c0_16 = arith.constant 0 : index
    %c0_17 = arith.constant 0 : index
    %45 = vector.load %arg6[%c0_14, %c0_15, %c0_16, %c0_17] : memref<1x8x16x128xf32, #tpu.memory_space<vmem>>, vector<1x8x16x128xf32>
    tpu.vector_store %arg6[%c0_14, %c0_15, %c0_16, %c0_17], %44 {strides = array<i32>} : memref<1x8x16x128xf32, #tpu.memory_space<vmem>>, vector<1x8x16x128xf32>,
    return
  }
  func.func @transform_0(%arg0: i32, %arg1: i32) -> (i32, i32, i32, i32) {
    %c0_i32 = arith.constant 0 : i32
    %c0_i32_0 = arith.constant 0 : i32
    %c0_i32_1 = arith.constant 0 : i32
    %c0_i32_2 = arith.constant 0 : i32
    return %arg0, %c0_i32, %c0_i32_0, %c0_i32_1 : i32, i32, i32, i32
  }
  func.func @transform_1(%arg0: i32, %arg1: i32) -> (i32, i32) {
    %c0_i32 = arith.constant 0 : i32
    %c0_i32_0 = arith.constant 0 : i32
    %c0_i32_1 = arith.constant 0 : i32
    return %c0_i32, %c0_i32_0 : i32, i32
  }
  func.func @transform_2(%arg0: i32, %arg1: i32) -> (i32, i32) {
    %c0_i32 = arith.constant 0 : i32
    %c0_i32_0 = arith.constant 0 : i32
    %c0_i32_1 = arith.constant 0 : i32
    return %c0_i32, %c0_i32_0 : i32, i32
  }
  func.func @transform_3(%arg0: i32, %arg1: i32) -> i32 {
    %c0_i32 = arith.constant 0 : i32
    %c0_i32_0 = arith.constant 0 : i32
    return %c0_i32 : i32
  }
  func.func @transform_4(%arg0: i32, %arg1: i32) -> (i32, i32, i32, i32) {
    %c0_i32 = arith.constant 0 : i32
    %c0_i32_0 = arith.constant 0 : i32
    %c0_i32_1 = arith.constant 0 : i32
    return %arg0, %arg1, %c0_i32, %c0_i32_0 : i32, i32, i32, i32
  }
}

</mosaic_0001>

<bundles_post_ra>
// kernel: tpu_custom_call.1
= control target key start
LH: loop header
LB: loop body
LE: loop exit
PB: predicated region body
PF: predicated region fallthrough
CT: control target
= control target key end

     0   :  { %s3257_s0 = inlined_call_operand.vmem [shape: f32[2,18,18,32], index: 0, kind: input, shape index: {}]   ;;  %s3258_s1 = inlined_call_operand.vmem [shape: f32[288,128], index: 1, kind: input, shape index: {}]   ;;  %s3259_s2 = inlined_call_operand.vmem [shape: f32[1,128], index: 2, kind: input, shape index: {}]   ;;  %s3260_s3 = inlined_call_operand.<no memory space> [shape: f32[1], index: 3, kind: input, shape index: {}]   ;;  %s3261_s4 = inlined_call_operand.hbm [shape: f32[2,16,16,128], index: 4, kind: output, shape index: {}]  }
   0x1   :  { %9 = sst [smem:[#allocation2]] %s3260_s3 }
   0x2   :  { %10 = vsyncpa [#allocation4], 0 }
   0x3   :  { %12 = vsyncpa [#allocation4 + $0x1], 0  ;;  %s2246_s17 = smov 0   ;;  %s2248_s18 = smov 0  }
   0x4   :  { %s2250_s19 = smov 0   ;;  %s2252_s20 = smov 0  }
   0x5   :  { %s2254_s21 = smov 0   ;;  %s2256_s22 = smov 0  }
   0x6   :  { %s2258_s23 = smov 0   ;;  %s2260_s24 = smov 0  }
   0x7 LB: > { %s1544_s3 = sadd.s32 4294967295, %s2210_s24   ;;  %s1545_s25 = sadd.s32 4294967294, %s2210_s24   ;;  %s2210_s24 = sphi %s2260_s24, %s18_s24   ;;  %s2206_s23 = sphi %s2258_s23, %s3290_s23   ;;  %s2202_s22 = sphi %s2256_s22, %s3289_s22   ;;  %s2198_s21 = sphi %s2254_s21, %s3288_s21   ;;  %s2194_s20 = sphi %s2252_s20, %s3287_s20   ;;  %s2190_s19 = sphi %s2250_s19, %s3286_s19   ;;  %s2186_s18 = sphi %s2248_s18, %s3285_s18   ;;  %s2182_s17 = sphi %s2246_s17, %s3284_s17  }
   0x8   : > { %s27_s26 = sadd.s32 1, %s2202_s22  ;;  %s30_s27 = sadd.s32 1, %s2206_s23 }
   0x9   : > { %p28_p0 = scmp.ge.s32.totalorder %s27_s26, 2  ;;  %p138_p1 = scmp.ne.s32.totalorder %s2190_s19, %s2186_s18 }
   0xa   : > { %p139_p2 = scmp.eq.s32.totalorder %s1544_s3, 3  ;;  %p144_p5 = scmp.ne.s32.totalorder %s2186_s18, %s2182_s17 }
   0xb   : > { %s3292_s26 = smov (%p28_p0, %s27_s26), 0  ;;  %s3294_s27 = smov (!%p28_p0, %s30_s27), %s2206_s23 }
   0xc   : > { %s124_s28 = ssub.s32 %s2202_s22, %s3292_s26  ;;  %p2297_p3 = por %p139_p2, %p138_p1 }
   0xd   : > { %p32_p4 = scmp.ge.s32.totalorder %s3294_s27, 2  ;;  %p145_p6 = scmp.eq.s32.totalorder %s1545_s25, 3 }
   0xe   : > { %p1548_p7 = scmp.ge.s32.totalorder %s2210_s24, 1  ;;  %p180_p9 = scmp.lt.s32.totalorder %s2210_s24, 5 }
   0xf   : > { %s3296_s27 = smov (%p32_p4, %s3294_s27), 0  ;;  %p2306_p8 = por %p145_p6, %p144_p5 }
  0x10   : > { %s123_s5 = ssub.s32 %s2206_s23, %s3296_s27  ;;  %s128_s6 = sadd.s32 1, %s2190_s19 }
  0x11   : > { %s125_s7 = sor.u32 %s124_s28, %s123_s5  ;;  %p181_p10 = pnand %p1548_p7, %p180_p9 }
  0x12   : > { %p126_p11 = scmp.eq.s32.totalorder %s125_s7, 0 }
  0x13   : > { %184 = sbr.rel (%p181_p10) target bundleno = 470 (0x1d6), region = 36 }
  0x14   : > { %s2315_s8 = scalar_select %p126_p11, %s2190_s19, %s128_s6  }
  0x18   : > { %p206_p12 = scmp.lt.s32.totalorder %s2198_s21, 1  ;;  %v1041_v0 = vld [vmem:[%s3258_s1 + $0xf8] sm:$0xff]  ;;  %v1040_v2 = vld [vmem:[%s3258_s1 + $0xf0] sm:$0xff]  ;;  %v1039_v4 = vld [vmem:[%s3258_s1 + $0xe8] sm:$0xff]  ;;  %s1552_s5 = smul.u32 192, %s2194_s20  ;;  %vm263_vm0 = vcmask 1046528  }
  0x19   : > { %v1025_v1 = vld [vmem:[%s3258_s1 + $0x78] sm:$0xff]  ;;  %1630 = vmatprep.subr.mxu0 %v1041_v0  ;;  %v1024_v3 = vld [vmem:[%s3258_s1 + $0x70] sm:$0xff]  ;;  %1762 = vmatprep.subr.mxu1 %v1041_v0  ;;  %v1023_v5 = vld [vmem:[%s3258_s1 + $0x68] sm:$0xff]  ;;  %vm304_vm1 = vcmask 1045504   ;;  %s2212_s28 = smov 64   ;;  %s2213_s11 = smov 32  }
  0x1a   : > { %s207_s3 = scalar_select %p206_p12, %s2198_s21, 1  ;;  %1631 = vmatpush3.msra.mxu0 %v1025_v1  ;;  %1778 = vmatpush3.msra.mxu1 %v1025_v1  ;;  %v1038_v6 = vld [vmem:[%s3258_s1 + $0xe0] sm:$0xff]  ;;  %v1037_v8 = vld [vmem:[%s3258_s1 + $0xd8] sm:$0xff]  ;;  %v1036_v10 = vld [vmem:[%s3258_s1 + $0xd0] sm:$0xff]  ;;  %vm911_vm2 = vcmask 261120   ;;  %vm928_vm3 = vcmask 523264  }
  0x1b   : > { %1632 = vmatprep.subr.mxu0 %v1040_v2  ;;  %1763 = vmatprep.subr.mxu1 %v1040_v2  ;;  %v1022_v7 = vld [vmem:[%s3258_s1 + $0x60] sm:$0xff]  ;;  %v1021_v9 = vld [vmem:[%s3258_s1 + $0x58] sm:$0xff]  ;;  %v1020_v11 = vld [vmem:[%s3258_s1 + $0x50] sm:$0xff]  ;;  %s2214_s12 = smov 96   ;;  %vm945_vm4 = vcmask 785408   ;;  %s203_s25 = sand.u32 1, %s2186_s18  }
  0x1c   : > { %s1794_s9 = smul.u32 432, %s207_s3  ;;  %1633 = vmatpush3.msra.mxu0 %v1024_v3  ;;  %1779 = vmatpush3.msra.mxu1 %v1024_v3  ;;  %v1035_v15 = vld [vmem:[%s3258_s1 + $0xc8] sm:$0xff]  ;;  %v1034_v27 = vld [vmem:[%s3258_s1 + $0xc0] sm:$0xff]  ;;  %v1033_v56 = vld [vmem:[%s3258_s1 + $0xb8] sm:$0xff]  ;;  %s1549_s10 = sshll.u32 %s203_s25, 7 }
  0x1d   : > { %1634 = vmatprep.subr.mxu0 %v1039_v4  ;;  %1764 = vmatprep.subr.mxu1 %v1039_v4  ;;  %v2388_v21 = vld [vmem:[%s3258_s1 + $0x48] sm:$0xff]  ;;  %v1018_v51 = vld [vmem:[%s3258_s1 + $0x40] sm:$0xff]  ;;  %v1017_v61 = vld [vmem:[%s3258_s1 + $0x38] sm:$0xff]  ;;  %s1625_s13 = sshll.u32 %s2198_s21, 5  ;;  %s3206_s15 = scalar_lea.sflag [#allocation4], %s203_s25 }
  0x1e   : > { %s210_s16 = scalar_lea.vmem %s3257_s0, %s1794_s9  ;;  %1635 = vmatpush3.msra.mxu0 %v1023_v5  ;;  %1780 = vmatpush3.msra.mxu1 %v1023_v5  ;;  %s3139_s9 = scalar_lea.vmem [#allocation3], %s1549_s10 }
  0x1f   : > { %s2350_s3 = scalar_lea.vmem %s210_s16, %s1552_s5  ;;  %1636 = vmatprep.subr.mxu0 %v1038_v6  ;;  %1765 = vmatprep.subr.mxu1 %v1038_v6  ;;  %v1032_v6 = vld [vmem:[%s3258_s1 + $0xb0] sm:$0xff]  ;;  %s1629_s5 = sshll.u32 %s2194_s20, 4 }
  0x20   : > { %v1582_v12 = vld [vmem:[%s2350_s3 + $0x38] sm:$0xff]  ;;  %v2363_v13 = vld [vmem:[%s2350_s3 + $0xc0] sm:$0xff]  ;;  %1637 = vmatpush3.msra.mxu0 %v1022_v7  ;;  %1781 = vmatpush3.msra.mxu1 %v1022_v7  ;;  %v2377_v18 = vld [vmem:[%s2350_s3 + $0x8] sm:$0xff] }
  0x21   : > { %3271 = vst [vmem:[#allocation6_spill] sm:$0xff] %v2363_v13  ;;  %v2366_v14 = vld [vmem:[%s2350_s3] sm:$0xff]  ;;  %v2372_v16 = vpack.i.bf16 %v2363_v13, %v1582_v12  ;;  %v2374_v17 = vrot.slane %v1582_v12, 1  ;;  %v2380_v19 = vld [vmem:[%s2350_s3 + $0x18] sm:$0xff]  ;;  %1638 = vmatprep.subr.mxu0 %v1037_v8  ;;  %1766 = vmatprep.subr.mxu1 %v1037_v8  ;;  %v265_v23 = vrot.slane %v2377_v18, 1  ;;  %v2394_v25 = vld [vmem:[%s2350_s3 + $0x30] sm:$0xff] }
  0x22   : > { %v2383_v20 = vld [vmem:[%s2350_s3 + $0x20] sm:$0xff]  ;;  %v264_v22 = vrot.slane %v2366_v14, 1  ;;  %v452_v24 = vrot.slane %v2380_v19, 2  ;;  %3272 = vst [vmem:[#allocation7_spill] sm:$0xff] %v2394_v25  ;;  %v2397_v26 = vld [vmem:[%s2350_s3 + $0xa8] sm:$0xff]  ;;  %1639 = vmatpush3.msra.mxu0 %v1021_v9  ;;  %1782 = vmatpush3.msra.mxu1 %v1021_v9  ;;  %v543_v29 = vrot.slane %v2394_v25, 1 }
  0x23   : > { %1872 = vrot.lane.b32.xlu1 %v2372_v16, %s2212_s28  ;;  %v2405_v28 = vrot.slane %v2383_v20, 2  ;;  %v305_v30 = vrot.slane %v2366_v14, 2  ;;  %v306_v31 = vrot.slane %v2377_v18, 2  ;;  %v2411_v32 = vld [vmem:[%s2350_s3 + $0x28] sm:$0x3]  ;;  %1640 = vmatprep.subr.mxu0 %v1036_v10  ;;  %v573_v33 = vrot.slane %v2363_v13, 1 }
  0x24   : > { %v266_v34 = vsel %vm263_vm0, %v264_v22, %v265_v23  ;;  %v2416_v35 = vld [vmem:[%s2350_s3 + $0xb0] sm:$0xff]  ;;  %v455_v36 = vrot.slane %v2411_v32, 2  ;;  %v482_v37 = vrot.slane %v2397_v26, 2  ;;  %1641 = vmatpush3.msra.mxu0 %v1020_v11  ;;  %1767 = vmatprep.subr.mxu1 %v1036_v10  ;;  %v2427_v40 = vsel %vm263_vm0, %v543_v29, %v2374_v17  ;;  %v2439_v44 = vld [vmem:[%s2350_s3 + $0x98] sm:$0xff]  ;;  %v2442_v45 = vld [vmem:[%s2350_s3 + $0x40] sm:$0x3] }
  0x25   : > { %v217_v38 = vld [vmem:[%s2350_s3 + $0x10] sm:$0x3]  ;;  %v2423_v39 = vsel %vm304_vm1, %v452_v24, %v2405_v28  ;;  %v307_v41 = vsel %vm304_vm1, %v305_v30, %v306_v31  ;;  %v2433_v42 = vrot.slane %v2416_v35, 2  ;;  %1642 = vmatprep.subr.mxu0 %v1035_v15  ;;  %1783 = vmatpush3.msra.mxu1 %v1020_v11  ;;  %v2444_v46 = vrot.slane %v1582_v12, 2  ;;  %v2452_v50 = vld [vmem:[%s2350_s3 + $0xc8] sm:$0xff] }
  0x26   : > { %v2436_v43 = vld [vmem:[%s2350_s3 + $0x90] sm:$0xff]  ;;  %v1876_v47 = vpack.i.bf16 %v266_v34, %v2423_v39  ;;  %v1886_v48 = vpack.i.bf16 %v2380_v19, %v2427_v40  ;;  %v456_v49 = vsel %vm304_vm1, %v2405_v28, %v455_v36  ;;  %1643 = vmatpush3.msra.mxu0 %v2388_v21  ;;  %v267_v53 = vrot.slane %v217_v38, 1  ;;  %1768 = vmatprep.subr.mxu1 %v1035_v15  ;;  %v2487_v2 = vld [vmem:[%s2350_s3 + $0xb8] sm:$0x3]  ;;  %v1015_v24 = vld [vmem:[%s3258_s1 + $0x28] sm:$0xff] }
  0x27   : > { %v2460_v52 = vsel %vm304_vm1, %v482_v37, %v2433_v42  ;;  %v294_v54 = vrot.slane %v2436_v43, 1  ;;  %v2464_v55 = vrot.slane %v2439_v44, 1  ;;  %1644 = vmatprep.subr.mxu0 %v1034_v27  ;;  %v1881_v57 = vpack.i.bf16 %v307_v41, %v2394_v25  ;;  %1784 = vmatpush3.msra.mxu1 %v2388_v21  ;;  %v1016_v9 = vld [vmem:[%s3258_s1 + $0x30] sm:$0xff]  ;;  %v1031_v21 = vld [vmem:[%s3258_s1 + $0xa8] sm:$0xff]  ;;  %v1030_v34 = vld [vmem:[%s3258_s1 + $0xa0] sm:$0xff] }
  0x28   : > { %1877 = vrot.lane.b32.xlu0 %v1876_v47, %s2213_s11  ;;  %1887 = vrot.lane.b32.xlu1 %v1886_v48, %s2214_s12  ;;  %v1891_v58 = vpack.i.bf16 %v2460_v52, %v456_v49  ;;  %v546_v59 = vrot.slane %v2442_v45, 1  ;;  %v2475_v60 = vrot.slane %v2452_v50, 1  ;;  %v268_v62 = vsel %vm263_vm0, %v265_v23, %v267_v53  ;;  %v235_v23 = vld [vmem:[%s2350_s3 + $0xa0] sm:$0x3]  ;;  %v2532_v29 = vld [vmem:[%s2350_s3 + $0x48] sm:$0xff] }
  0x29   : > { %v2483_v63 = vsel %vm263_vm0, %v294_v54, %v2464_v55  ;;  %v308_v0 = vrot.slane %v217_v38, 2  ;;  %v335_v1 = vrot.slane %v2436_v43, 2  ;;  %1645 = vmatpush3.msra.mxu0 %v1018_v51  ;;  %v2497_v5 = vrot.slane %v2439_v44, 2  ;;  %1769 = vmatprep.subr.mxu1 %v1034_v27  ;;  %3273 = vst [vmem:[#allocation8_spill] sm:$0xff] %v2532_v29  ;;  %v2535_v30 = vld [vmem:[%s2350_s3 + $0x50] sm:$0xff]  ;;  %v1014_v47 = vld [vmem:[%s3258_s1 + $0x20] sm:$0xff] }
  0x2a   : > { %v547_v3 = vsel %vm263_vm0, %v2374_v17, %v546_v59  ;;  %v2494_v4 = vsel %vm263_vm0, %v573_v33, %v2475_v60  ;;  %1646 = vmatprep.subr.mxu0 %v1033_v56  ;;  %v1896_v7 = vpack.i.bf16 %v2483_v63, %v268_v62  ;;  %v457_v8 = vrot.slane %v2394_v25, 2  ;;  %1785 = vmatpush3.msra.mxu1 %v1018_v51  ;;  %v2557_v53 = vld [vmem:[%s2350_s3 + $0x40] sm:$0x3]  ;;  %v1029_v54 = vld [vmem:[%s3258_s1 + $0x98] sm:$0xff] }
  0x2b   : > { %1647 = vmatpush3.msra.mxu0 %v1017_v61  ;;  %v1911_v10 = vpack.i.bf16 %v2494_v4, %v547_v3  ;;  %v309_v11 = vsel %vm304_vm1, %v306_v31, %v308_v0  ;;  %v2515_v12 = vsel %vm304_vm1, %v335_v1, %v2497_v5  ;;  %v485_v15 = vrot.slane %v2487_v2, 2  ;;  %1770 = vmatprep.subr.mxu1 %v1033_v56  ;;  %v1601_v31 = vld [vmem:[%s2350_s3 + $0xd0] sm:$0x3] }
  0x2c   : > { %1882 = vrot.lane.b32.xlu0 %v1881_v57, %s2212_s28  ;;  %1892 = vrot.lane.b32.xlu1 %v1891_v58, %s2213_s11  ;;  %v2523_v22 = vsel %vm304_vm1, %v457_v8, %v2444_v46  ;;  %v1901_v33 = vpack.i.bf16 %v2515_v12, %v309_v11  ;;  %v269_v37 = vrot.slane %v2380_v19, 1  ;;  %v2547_v38 = vrot.slane %v2383_v20, 1  ;;  %v1013_v58 = vld [vmem:[%s3258_s1 + $0x18] sm:$0xff]  ;;  %v1028_v1 = vld [vmem:[%s3258_s1 + $0x90] sm:$0xff] }
  0x2d   : > { %1648 = vmatprep.subr.mxu0 %v1032_v6  ;;  %v486_v27 = vsel %vm304_vm1, %v2433_v42, %v485_v15  ;;  %1786 = vmatpush3.msra.mxu1 %v1017_v61  ;;  %v297_v41 = vrot.slane %v235_v23, 1  ;;  %v548_v48 = vrot.slane %v2532_v29, 1  ;;  %v2554_v49 = vrot.slane %v2535_v30, 1 }
  0x2e   : > { %1649 = vmatpush3.msra.mxu0 %v1016_v9  ;;  %1771 = vmatprep.subr.mxu1 %v1032_v6  ;;  %v1916_v36 = vpack.i.bf16 %v486_v27, %v2523_v22  ;;  %v576_v51 = vrot.slane %v1601_v31, 1  ;;  %v3262_v56 = vrot.slane %v2363_v13, 2  ;;  %v1906_v57 = vpack.i.bf16 %v2397_v26, %v2383_v20 }
  0x2f   : > { %1650 = vmatprep.subr.mxu0 %v1031_v21  ;;  %1787 = vmatpush3.msra.mxu1 %v1016_v9  ;;  %v2572_v59 = vpack.i.bf16 %v2452_v50, %v2532_v29  ;;  %v2576_v61 = vsel %vm263_vm0, %v269_v37, %v2547_v38  ;;  %v298_v62 = vsel %vm263_vm0, %v2464_v55, %v297_v41  ;;  %v338_v0 = vrot.slane %v235_v23, 2  ;;  %v1012_v9 = vld [vmem:[%s3258_s1 + $0x10] sm:$0xff]  ;;  %v220_v23 = vld [vmem:[%s2350_s3 + $0x28] sm:$0x3]  ;;  %v1026_v37 = vld [vmem:[%s3258_s1 + $0x80] sm:$0xff] }
  0x30   : > { %1897 = vrot.lane.b32.xlu0 %v1896_v7, %s2213_s11  ;;  %1912 = vrot.lane.b32.xlu1 %v1911_v10, %s2214_s12  ;;  %v2585_v3 = vsel %vm263_vm0, %v548_v48, %v2554_v49  ;;  %v577_v6 = vsel %vm263_vm0, %v2475_v60, %v576_v51  ;;  %v460_v7 = vrot.slane %v2557_v53, 2  ;;  %v488_v8 = vrot.slane %v2452_v50, 2  ;;  %v1027_v10 = vld [vmem:[%s3258_s1 + $0x88] sm:$0xff]  ;;  %v1010_v48 = vld [vmem:[%s3258_s1] sm:$0xff] }
  0x31   : > { %1651 = vmatpush3.msra.mxu0 %v1015_v24  ;;  %1772 = vmatprep.subr.mxu1 %v1031_v21  ;;  %v1921_v11 = vpack.i.bf16 %v298_v62, %v2576_v61  ;;  %v1936_v15 = vpack.i.bf16 %v577_v6, %v2585_v3  ;;  %v339_v21 = vsel %vm304_vm1, %v2497_v5, %v338_v0  ;;  %v2641_v0 = vld [vmem:[%s2350_s3 + $0xd0] sm:$0x3] }
  0x32   : > { %1652 = vmatprep.subr.mxu0 %v1030_v34  ;;  %1788 = vmatpush3.msra.mxu1 %v1015_v24  ;;  %v1011_v24 = vld [vmem:[%s3258_s1 + $0x8] sm:$0xff]  ;;  %v461_v27 = vsel %vm304_vm1, %v2444_v46, %v460_v7  ;;  %v489_v31 = vsel %vm304_vm1, %v3262_v56, %v488_v8  ;;  %v1931_v41 = vpack.i.bf16 %v339_v21, %v2423_v39  ;;  %v462_v21 = vrot.slane %v2532_v29, 2 }
  0x33   : > { %1653 = vmatpush3.msra.mxu0 %v1014_v47  ;;  %1773 = vmatprep.subr.mxu1 %v1030_v34  ;;  %v2619_v34 = vld [vmem:[%s2350_s3 + $0xd8] sm:$0xff]  ;;  %v1946_v51 = vpack.i.bf16 %v489_v31, %v461_v27  ;;  %v2662_v27 = vrot.slane %v2535_v30, 2  ;;  %v490_v31 = vrot.slane %v2641_v0, 2 }
  0x34   : > { %1902 = vrot.lane.b32.xlu0 %v1901_v33, %s2212_s28  ;;  %1917 = vrot.lane.b32.xlu1 %v1916_v36, %s2213_s11  ;;  %v2616_v33 = vld [vmem:[%s2350_s3 + $0x58] sm:$0x3]  ;;  %v2622_v36 = vld [vmem:[%s2350_s3 + $0xe0] sm:$0xff]  ;;  %v578_v39 = vrot.slane %v2619_v34, 1  ;;  %v1956_v6 = vpack.i.bf16 %v2619_v34, %v2535_v30 }
  0x35   : > { %1654 = vmatprep.subr.mxu0 %v1029_v54  ;;  %1789 = vmatpush3.msra.mxu1 %v1014_v47  ;;  %v272_v47 = vrot.slane %v220_v23, 1  ;;  %v3263_v62 = vrot.slane %v2622_v36, 1 }
  0x36   : > { %1655 = vmatpush3.msra.mxu0 %v1013_v58  ;;  %1774 = vmatprep.subr.mxu1 %v1029_v54  ;;  %v299_v54 = vrot.slane %v2397_v26, 1 }
  0x37   : > { %1656 = vmatprep.subr.mxu0 %v1028_v1  ;;  %1790 = vmatpush3.msra.mxu1 %v1013_v58  ;;  %v551_v58 = vrot.slane %v2616_v33, 1  ;;  %v273_v7 = vsel %vm263_vm0, %v2547_v38, %v272_v47  ;;  %v238_v47 = vld [vmem:[%s2350_s3 + $0xb8] sm:$0x3] }
  0x38   : > { %1907 = vrot.lane.b32.xlu0 %v1906_v57, %s2214_s12  ;;  %1927 = vrot.lane.b32.xlu1 %v2572_v59, %s2212_s28  ;;  %v2635_v57 = vrot.slane %v2416_v35, 1 }
  0x39   : > { %1657 = vmatpush3.msra.mxu0 %v1012_v9  ;;  %1775 = vmatprep.subr.mxu1 %v1028_v1  ;;  %v1941_v1 = vpack.i.bf16 %v2416_v35, %v2394_v25  ;;  %v1569_v25 = vld [vmem:[%s2350_s3 + $0x88] sm:$0x3] }
  0x3a   : > { %1658 = vmatprep.subr.mxu0 %v1027_v10  ;;  %1791 = vmatpush3.msra.mxu1 %v1012_v9  ;;  %v552_v9 = vsel %vm263_vm0, %v2554_v49, %v551_v58  ;;  %v2676_v58 = vld [vmem:[%s2350_s3 + $0xa0] sm:$0x3] }
  0x3b   : > { %1659 = vmatpush3.msra.mxu0 %v1011_v24  ;;  %1776 = vmatprep.subr.mxu1 %v1027_v10  ;;  %v580_v10 = vsel %vm263_vm0, %v578_v39, %v3263_v62  ;;  %3274 = vst [vmem:[#allocation9_spill] sm:$0xff] %v2676_v58  ;;  %v2688_v39 = vld [vmem:[%s2350_s3 + $0x80] sm:$0xff]  ;;  %v566_v50 = vrot.slane %v2676_v58, 1  ;;  %v434_v62 = vrot.slane %v2641_v0, 1 }
  0x3c   : > { %1922 = vrot.lane.b32.xlu0 %v1921_v11, %s2213_s11  ;;  %1937 = vrot.lane.b32.xlu1 %v1936_v15, %s2214_s12  ;;  %v2653_v11 = vsel %vm263_vm0, %v299_v54, %v2635_v57  ;;  %v313_v15 = vrot.slane %v220_v23, 2  ;;  %v2673_v54 = vld [vmem:[%s2350_s3 + $0x68] sm:$0xff] }
  0x3d   : > { %1660 = vmatprep.subr.mxu0 %v1026_v37  ;;  %1792 = vmatpush3.msra.mxu1 %v1011_v24  ;;  %v1951_v23 = vpack.i.bf16 %v2653_v11, %v273_v7  ;;  %v429_v7 = vrot.slane %v2487_v2, 1  ;;  %v2719_v58 = vsel %vm263_vm0, %v2464_v55, %v566_v50 }
  0x3e   : > { %1661 = vmatpush3.msra.mxu0 %v1010_v48  ;;  %1777 = vmatprep.subr.mxu1 %v1026_v37  ;;  %v314_v24 = vsel %vm304_vm1, %v2405_v28, %v313_v15  ;;  %v2682_v37 = vsel %vm304_vm1, %v462_v21, %v2662_v27  ;;  %v302_v15 = vrot.slane %v238_v47, 1  ;;  %v223_v21 = vld [vmem:[%s2350_s3 + $0x40] sm:$0x3] }
  0x3f   : > { %1793 = vmatpush3.msra.mxu1 %v1010_v48  ;;  %v491_v48 = vsel %vm304_vm1, %v488_v8, %v490_v31  ;;  %v2704_v8 = vld [vmem:[%s2350_s3 + $0xa0] sm:$0x3]  ;;  %v2712_v31 = vrot.slane %v2688_v39, 1  ;;  %v277_v55 = vrot.slane %v223_v21, 1 }
  0x40   : > { %1932 = vrot.lane.b32.xlu0 %v1931_v41, %s2212_s28  ;;  %1947 = vrot.lane.b32.xlu1 %v1946_v51, %s2213_s11  ;;  %v2666_v41 = vld [vmem:[%s2350_s3 + $0x60] sm:$0xff]  ;;  %v1966_v51 = vpack.i.bf16 %v580_v10, %v552_v9  ;;  %v2696_v9 = vld [vmem:[%s2350_s3 + $0xe8] sm:$0x3]  ;;  %v2700_v10 = vrot.slane %v2673_v54, 1  ;;  %3275 = vst [vmem:[#allocation10_spill] sm:$0xff] %v2704_v8  ;;  %v1976_v2 = vpack.i.bf16 %v491_v48, %v2682_v37  ;;  %v480_v48 = vrot.slane %v2704_v8, 2 }
  0x41   : > { %v553_v28 = vrot.slane %v2666_v41, 1  ;;  %v581_v13 = vrot.slane %v2696_v9, 1  ;;  %v303_v0 = vsel %vm263_vm0, %v2635_v57, %v302_v15 }
  0x42   : > { %v2748_v15 = vsel %vm304_vm1, %v2497_v5, %v480_v48  ;;  %v1589_v5 = vld [vmem:[%s2350_s3 + $0x70] sm:$0x3] }
  0x43   : > { %v2733_v29 = vsel %vm263_vm0, %v553_v28, %v2700_v10  ;;  %v2752_v28 = vsel %vm263_vm0, %v2635_v57, %v429_v7 }
  0x44   : > { %1942 = vrot.lane.b32.xlu0 %v1941_v1, %s2214_s12  ;;  %1957 = vrot.lane.b32.xlu1 %v1956_v6, %s2212_s28  ;;  %v2691_v1 = vld [vmem:[%s2350_s3 + $0x88] sm:$0x3]  ;;  %v399_v6 = vrot.slane %v2411_v32, 1  ;;  %v1961_v32 = vpack.i.bf16 %v2460_v52, %v314_v24  ;;  %v343_v52 = vrot.slane %v238_v47, 2 }
  0x45   : > { %v292_v56 = vrot.slane %v2691_v1, 1 }
  0x46   : > { %v2737_v50 = vsel %vm263_vm0, %v2547_v38, %v399_v6  ;;  %v3276_v38 = vrot.slane %v2622_v36, 1 }
  0x47   : > { %v2726_v24 = vsel %vm263_vm0, %v2712_v31, %v292_v56  ;;  %v2742_v56 = vld [vmem:[%s3258_s1 + $0x118] sm:$0xff] }
  0x48   : > { %1952 = vrot.lane.b32.xlu0 %v1951_v23, %s2213_s11  ;;  %1967 = vrot.lane.b32.xlu1 %v1966_v51, %s2214_s12  ;;  %v1986_v23 = vpack.i.bf16 %v2622_v36, %v2666_v41  ;;  %v1563_v51 = vld [vmem:[%s2350_s3 + $0x58] sm:$0x3]  ;;  %v582_v6 = vsel %vm263_vm0, %v3276_v38, %v581_v13  ;;  %v1981_v13 = vpack.i.bf16 %v303_v0, %v2427_v40 }
  0x49   : > { %v409_v47 = vrot.slane %v1563_v51, 1  ;;  %v465_v8 = vrot.slane %v1563_v51, 2  ;;  %1730 = vmatprep.subr.mxu1 %v2742_v56  ;;  %v1996_v7 = vpack.i.bf16 %v582_v6, %v2733_v29  ;;  %v556_v51 = vrot.slane %v1589_v5, 1  ;;  %v226_v0 = vld [vmem:[%s2350_s3 + $0x58] sm:$0x3] }
  0x4a   : > { %v467_v6 = vrot.slane %v2666_v41, 2 }
  0x4c   : > { %1962 = vrot.lane.b32.xlu0 %v1961_v32, %s2212_s28  ;;  %1977 = vrot.lane.b32.xlu1 %v1976_v2, %s2213_s11  ;;  %v2761_v32 = vsel %vm263_vm0, %v2475_v60, %v434_v62  ;;  %v586_v2 = vrot.slane %v2442_v45, 2  ;;  %v344_v60 = vsel %vm304_vm1, %v2433_v42, %v343_v52  ;;  %v278_v62 = vsel %vm263_vm0, %v2374_v17, %v277_v55  ;;  %v1566_v55 = vld [vmem:[%s2350_s3 + $0x70] sm:$0x3] }
  0x4d   : > { %v466_v45 = vsel %vm304_vm1, %v2662_v27, %v465_v8  ;;  %v1991_v48 = vpack.i.bf16 %v344_v60, %v2523_v22  ;;  %v557_v52 = vsel %vm263_vm0, %v2700_v10, %v556_v51  ;;  %v2801_v60 = vld [vmem:[%s2350_s3 + $0x78] sm:$0xff]  ;;  %v596_v51 = vrot.slane %v1589_v5, 2 }
  0x4e   : > { %v2006_v42 = vpack.i.bf16 %v278_v62, %v466_v45  ;;  %v2789_v8 = vsel %vm304_vm1, %v2444_v46, %v586_v2  ;;  %v2016_v38 = vpack.i.bf16 %v2535_v30, %v557_v52  ;;  %v414_v2 = vrot.slane %v1566_v55, 1 }
  0x4f   : > { %v470_v62 = vrot.slane %v1566_v55, 2 }
  0x50   : > { %1972 = vrot.lane.b32.xlu0 %v2372_v16, %s2214_s12  ;;  %1987 = vrot.lane.b32.xlu1 %v1986_v23, %s2212_s28  ;;  %v2779_v16 = vsel %vm263_vm0, %v2554_v49, %v409_v47  ;;  %v318_v23 = vrot.slane %v223_v21, 2  ;;  %v591_v47 = vrot.slane %v2616_v33, 2  ;;  %v1592_v33 = vld [vmem:[%s2350_s3 + $0x88] sm:$0x3] }
  0x51   : > { %v561_v55 = vrot.slane %v1592_v33, 1 }
  0x52   : > { %v319_v21 = vsel %vm304_vm1, %v2444_v46, %v318_v23  ;;  %v2805_v46 = vsel %vm304_vm1, %v2662_v27, %v591_v47  ;;  %v473_v47 = vrot.slane %v2688_v39, 2 }
  0x53   : > { %v2011_v45 = vpack.i.bf16 %v319_v21, %v2673_v54  ;;  %v2826_v21 = vsel %vm263_vm0, %v2700_v10, %v414_v2  ;;  %v562_v2 = vsel %vm263_vm0, %v2712_v31, %v561_v55  ;;  %v475_v55 = vrot.slane %v1569_v25, 2 }
  0x54   : > { %1982 = vrot.lane.b32.xlu0 %v1981_v13, %s2213_s11  ;;  %1997 = vrot.lane.b32.xlu1 %v1996_v7, %s2214_s12  ;;  %v468_v13 = vrot.slane %v2673_v54, 2  ;;  %v282_v7 = vrot.slane %v226_v0, 1 }
  0x56   : > { %v2813_v23 = vsel %vm304_vm1, %v467_v6, %v468_v13  ;;  %v283_v52 = vsel %vm263_vm0, %v2554_v49, %v282_v7  ;;  %v471_v5 = vsel %vm304_vm1, %v468_v13, %v470_v62  ;;  %v323_v7 = vrot.slane %v226_v0, 2 }
  0x57   : > { %v2021_v6 = vpack.i.bf16 %v2585_v3, %v2813_v23  ;;  %v2036_v49 = vpack.i.bf16 %v283_v52, %v471_v5  ;;  %v419_v5 = vrot.slane %v1569_v25, 1 }
  0x58   : > { %1992 = vrot.lane.b32.xlu0 %v1991_v48, %s2212_s28  ;;  %2007 = vrot.lane.b32.xlu1 %v2006_v42, %s2213_s11  ;;  %v558_v48 = vrot.slane %v2801_v60, 1  ;;  %v2026_v42 = vpack.i.bf16 %v2682_v37, %v2801_v60  ;;  %v324_v0 = vsel %vm304_vm1, %v2662_v27, %v323_v7  ;;  %v476_v7 = vsel %vm304_vm1, %v473_v47, %v475_v55 }
  0x59   : > { %v2865_v25 = vsel %vm263_vm0, %v2712_v31, %v419_v5  ;;  %v333_v55 = vrot.slane %v2691_v1, 2 }
  0x5a   : > { %v2835_v62 = vsel %vm263_vm0, %v558_v48, %v2712_v31  ;;  %v2046_v48 = vpack.i.bf16 %v2673_v54, %v562_v2  ;;  %v2061_v31 = vpack.i.bf16 %v2801_v60, %v2483_v63 }
  0x5c   : > { %2002 = vrot.lane.b32.xlu0 %v2572_v59, %s2214_s12  ;;  %2017 = vrot.lane.b32.xlu1 %v2016_v38, %s2214_s12  ;;  %v2822_v59 = vsel %vm304_vm1, %v468_v13, %v596_v51  ;;  %v601_v38 = vrot.slane %v1592_v33, 2  ;;  %v229_v33 = vld [vmem:[%s2350_s3 + $0x70] sm:$0x3] }
  0x5d   : > { %v287_v52 = vrot.slane %v229_v33, 1 }
  0x5e   : > { %v2840_v51 = vsel %vm304_vm1, %v473_v47, %v601_v38  ;;  %v2041_v38 = vpack.i.bf16 %v324_v0, %v2688_v39  ;;  %v328_v0 = vrot.slane %v229_v33, 2 }
  0x5f   : > { %v288_v27 = vsel %vm263_vm0, %v2700_v10, %v287_v52  ;;  %v619_v10 = vrot.slane %v2622_v36, 2  ;;  %v2076_v52 = vpack.i.bf16 %v2688_v39, %v2719_v58  ;;  %v2888_v36 = vld [vmem:[%s2350_s3 + $0xb8] sm:$0x3] }
  0x60   : > { %2012 = vrot.lane.b32.xlu0 %v2011_v45, %s2212_s28  ;;  %2027 = vrot.lane.b32.xlu1 %v2026_v42, %s2212_s28  ;;  %v2031_v45 = vpack.i.bf16 %v2666_v41, %v2835_v62  ;;  %v472_v42 = vrot.slane %v2801_v60, 2  ;;  %v329_v33 = vsel %vm304_vm1, %v468_v13, %v328_v0  ;;  %v571_v58 = vrot.slane %v2888_v36, 1 }
  0x61   : > { %v2081_v13 = vpack.i.bf16 %v2835_v62, %v2515_v12  ;;  %v334_v12 = vsel %vm304_vm1, %v473_v47, %v333_v55 }
  0x62   : > { %v2101_v1 = vpack.i.bf16 %v334_v12, %v2416_v35 }
  0x64   : > { %2022 = vrot.lane.b32.xlu0 %v2021_v6, %s2213_s11  ;;  %2037 = vrot.lane.b32.xlu1 %v2036_v49, %s2213_s11  ;;  %v2056_v6 = vpack.i.bf16 %v2813_v23, %v2436_v43  ;;  %v2858_v49 = vsel %vm304_vm1, %v472_v42, %v473_v47  ;;  %v621_v42 = vrot.slane %v2696_v9, 2  ;;  %v2071_v9 = vpack.i.bf16 %v329_v33, %v2439_v44 }
  0x65   : > { %v2051_v2 = vpack.i.bf16 %v2733_v29, %v2858_v49  ;;  %v2086_v63 = vpack.i.bf16 %v2858_v49, %v2397_v26 }
  0x68   : > { %2032 = vrot.lane.b32.xlu0 %v2031_v45, %s2214_s12  ;;  %2047 = vrot.lane.b32.xlu1 %v2046_v48, %s2214_s12  ;;  %v2066_v45 = vpack.i.bf16 %v288_v27, %v476_v7  ;;  %v618_v48 = vrot.slane %v2619_v34, 2  ;;  %v2885_v34 = vsel %vm304_vm1, %v619_v10, %v621_v42  ;;  %v3277_v27 = vpack.i.bf16 %v2726_v24, %v2748_v15 }
  0x6a   : > { %v2881_v5 = vsel %vm304_vm1, %v618_v48, %v619_v10 }
  0x6c   : > { %2042 = vrot.lane.b32.xlu0 %v2041_v38, %s2212_s28  ;;  %2057 = vrot.lane.b32.xlu1 %v2056_v6, %s2212_s28  ;;  %v572_v38 = vsel %vm263_vm0, %v2635_v57, %v571_v58  ;;  %v2091_v6 = vpack.i.bf16 %v2436_v43, %v2653_v11 }
  0x6d   : > { %v2106_v7 = vpack.i.bf16 %v2439_v44, %v572_v38 }
  0x70   : > { %2052 = vrot.lane.b32.xlu0 %v2051_v2, %s2213_s11  ;;  %2067 = vrot.lane.b32.xlu1 %v2066_v45, %s2213_s11 }
  0x74   : > { %2062 = vrot.lane.b32.xlu0 %v2061_v31, %s2214_s12  ;;  %2077 = vrot.lane.b32.xlu1 %v2076_v52, %s2214_s12 }
  0x78   : > { %2072 = vrot.lane.b32.xlu0 %v2071_v9, %s2212_s28  ;;  %2087 = vrot.lane.b32.xlu1 %v2086_v63, %s2212_s28 }
  0x7c   : > { %2082 = vrot.lane.b32.xlu0 %v2081_v13, %s2213_s11  ;;  %2097 = vrot.lane.b32.xlu1 %v3277_v27, %s2213_s11 }
  0x80   : > { %2092 = vrot.lane.b32.xlu0 %v2091_v6, %s2214_s12  ;;  %2107 = vrot.lane.b32.xlu1 %v2106_v7, %s2214_s12  ;;  %s1458_s12 = sshll.u32 %s3139_s9, 4  ;;  %s3201_s12 = int_to_ptr.vmem [resolvable:$true] %s1458_s12 }
  0x81   : > { %s2118_s16 = scalar_lea.vmem %s3201_s12, 2048 }
  0x82   : > { %p2119_p13 = scmp.ne.s32.totalorder %s3201_s12, %s2118_s16 }
  0x84   : > { %2102 = vrot.lane.b32.xlu0 %v2101_v1, %s2212_s28  ;;  %s1455_s28 = sadd.s32 %s1629_s5, %s1625_s13  ;;  %p2120_p0 = pnand %p2119_p13, %p2297_p3 }
  0x85   : > { %s1626_s11 = sshll.u32 %s1455_s28, 7 }
  0x86   : > { %s3199_s14 = scalar_lea.hbm %s3261_s4, %s1626_s11  ;;  %p2121_p1 = pneg %p2120_p0 }
  0x95   : > { %v1873_v57 = vpop.permute.xlu1 %1872 }
  0x96   : > { %v1875_v6 = vunpack.i.h.bf16 %v1873_v57  ;;  %v1874_v27 = vunpack.i.l.bf16 %v1873_v57 }
  0x9a   : > { %v1878_v2 = vpop.permute.xlu0 %1877  ;;  %v1888_v45 = vpop.permute.xlu1 %1887 }
  0x9b   : > { %v1880_v0 = vunpack.i.h.bf16 %v1878_v2  ;;  %v1879_v48 = vunpack.i.l.bf16 %v1878_v2  ;;  %v1890_v24 = vunpack.i.h.bf16 %v1888_v45  ;;  %v1889_v15 = vunpack.i.l.bf16 %v1888_v45 }
  0x9d   : > { %v962_v9 = vsel %vm911_vm2, %v2576_v61, %v1879_v48  ;;  %v912_v63 = vsel %vm911_vm2, %v2366_v14, %v1880_v0 }
  0x9e   : > { %v1883_v10 = vpop.permute.xlu0 %1882  ;;  %v1893_v42 = vpop.permute.xlu1 %1892 }
  0x9f   : > { %v1885_v47 = vunpack.i.h.bf16 %v1883_v10  ;;  %v1884_v31 = vunpack.i.l.bf16 %v1883_v10  ;;  %v1895_v52 = vunpack.i.h.bf16 %v1893_v42  ;;  %v1894_v33 = vunpack.i.l.bf16 %v1893_v42 }
  0xa1   : > { %v978_v58 = vsel %vm928_vm3, %v962_v9, %v1884_v31  ;;  %v929_v13 = vsel %vm928_vm3, %v912_v63, %v1885_v47  ;;  %v963_v55 = vsel %vm911_vm2, %v2737_v50, %v1894_v33  ;;  %v974_v38 = vsel %vm911_vm2, %v2653_v11, %v1895_v52 }
  0xa2   : > { %v1898_v7 = vpop.permute.xlu0 %1897  ;;  %v1913_v12 = vpop.permute.xlu1 %1912  ;;  %v994_v1 = vsel %vm945_vm4, %v978_v58, %v1889_v15  ;;  %v946_v61 = vsel %vm945_vm4, %v929_v13, %v1890_v24  ;;  %v979_v45 = vsel %vm928_vm3, %v963_v55, %v1874_v27  ;;  %v990_v0 = vsel %vm928_vm3, %v974_v38, %v1875_v6 }
  0xa3   : > { %v1915_v2 = vunpack.i.h.bf16 %v1913_v12  ;;  %v1914_v14 = vunpack.i.l.bf16 %v1913_v12  ;;  %1149 = vmatprep.mubr.f32.mxu0 %v994_v1  ;;  %v1900_v10 = vunpack.i.h.bf16 %v1898_v7  ;;  %v1899_v15 = vunpack.i.l.bf16 %v1898_v7 }
  0xa4   : > { %1150 = vmatmul.mubr.f32.vlgmr.msra.gmra.mxu0 %v946_v61 }
  0xa5   : > { %v995_v50 = vsel %vm945_vm4, %v979_v45, %v1914_v14  ;;  %v1006_v11 = vsel %vm945_vm4, %v990_v0, %v1915_v2  ;;  %v913_v58 = vsel %vm911_vm2, %v2377_v18, %v1899_v15  ;;  %v924_v13 = vsel %vm911_vm2, %v2436_v43, %v1900_v10  ;;  %v1044_v18 = vld [vmem:[%s3258_s1 + $0x110] sm:$0xff] }
  0xa6   : > { %v1903_v48 = vpop.permute.xlu0 %1902  ;;  %v1918_v57 = vpop.permute.xlu1 %1917  ;;  %1154 = vmatprep.mubr.f32.mxu0 %v995_v50  ;;  %1209 = vmatprep.mubr.f32.mxu1 %v1006_v11 }
  0xa7   : > { %v1905_v42 = vunpack.i.h.bf16 %v1903_v48  ;;  %v1904_v24 = vunpack.i.l.bf16 %v1903_v48  ;;  %v1920_v47 = vunpack.i.h.bf16 %v1918_v57  ;;  %v1919_v31 = vunpack.i.l.bf16 %v1918_v57 }
  0xa8   : > { %v404_v48 = vrot.slane %v2557_v53, 1 }
  0xa9   : > { %v930_v6 = vsel %vm928_vm3, %v913_v58, %v1904_v24  ;;  %v941_v27 = vsel %vm928_vm3, %v924_v13, %v1905_v42  ;;  %v964_v1 = vsel %vm911_vm2, %v2427_v40, %v1919_v31  ;;  %v975_v61 = vsel %vm911_vm2, %v2752_v28, %v1920_v47  ;;  %v1043_v40 = vld [vmem:[%s3258_s1 + $0x108] sm:$0xff] }
  0xaa   : > { %v1908_v52 = vpop.permute.xlu0 %1907  ;;  %v1928_v33 = vpop.permute.xlu1 %1927  ;;  %v405_v53 = vsel %vm263_vm0, %v2374_v17, %v404_v48 }
  0xab   : > { %v1910_v9 = vunpack.i.h.bf16 %v1908_v52  ;;  %v1909_v63 = vunpack.i.l.bf16 %v1908_v52  ;;  %v1930_v55 = vunpack.i.h.bf16 %v1928_v33  ;;  %v1929_v38 = vunpack.i.l.bf16 %v1928_v33 }
  0xad   : > { %v947_v7 = vsel %vm945_vm4, %v930_v6, %v1909_v63  ;;  %v958_v12 = vsel %vm945_vm4, %v941_v27, %v1910_v9  ;;  %v980_v0 = vsel %vm928_vm3, %v964_v1, %v1929_v38  ;;  %v991_v50 = vsel %vm928_vm3, %v975_v61, %v1930_v55 }
  0xae   : > { %v1923_v43 = vpop.permute.xlu0 %1922  ;;  %1155 = vmatmul.mubr.f32.gmra.mxu0 %v947_v7  ;;  %1210 = vmatmul.mubr.f32.vlgmr.msra.gmra.mxu1 %v958_v12  ;;  %v1938_v2 = vpop.permute.xlu1 %1937 }
  0xaf   : > { %v1940_v14 = vunpack.i.h.bf16 %v1938_v2  ;;  %v1939_v45 = vunpack.i.l.bf16 %v1938_v2  ;;  %1731 = vmatpush3.msra.mxu1 %v2742_v56  ;;  %v1042_v56 = vld [vmem:[%s3258_s1 + $0x100] sm:$0xff]  ;;  %v1925_v15 = vunpack.i.h.bf16 %v1923_v43  ;;  %v1924_v42 = vunpack.i.l.bf16 %v1923_v43 }
  0xb0   : > { %1732 = vmatprep.subr.mxu1 %v1044_v18 }
  0xb1   : > { %v996_v28 = vsel %vm945_vm4, %v980_v0, %v1939_v45  ;;  %v1007_v11 = vsel %vm945_vm4, %v991_v50, %v1940_v14  ;;  %1733 = vmatpush3.msra.mxu1 %v1044_v18  ;;  %v914_v13 = vsel %vm911_vm2, %v2380_v19, %v1924_v42  ;;  %v925_v55 = vsel %vm911_vm2, %v2439_v44, %v1925_v15 }
  0xb2   : > { %v1933_v57 = vpop.permute.xlu0 %1932  ;;  %v1948_v10 = vpop.permute.xlu1 %1947  ;;  %1159 = vmatprep.mubr.f32.mxu0 %v996_v28  ;;  %1214 = vmatprep.mubr.f32.mxu1 %v1007_v11 }
  0xb3   : > { %1734 = vmatprep.subr.mxu1 %v1043_v40  ;;  %v1935_v24 = vunpack.i.h.bf16 %v1933_v57  ;;  %v1934_v47 = vunpack.i.l.bf16 %v1933_v57  ;;  %v1950_v31 = vunpack.i.h.bf16 %v1948_v10  ;;  %v1949_v52 = vunpack.i.l.bf16 %v1948_v10 }
  0xb4   : > { %1735 = vmatpush3.msra.mxu1 %v1043_v40 }
  0xb5   : > { %1736 = vmatprep.subr.mxu1 %v1042_v56  ;;  %v931_v27 = vsel %vm928_vm3, %v914_v13, %v1934_v47  ;;  %v942_v7 = vsel %vm928_vm3, %v925_v55, %v1935_v24  ;;  %v965_v17 = vsel %vm911_vm2, %v405_v53, %v1949_v52  ;;  %v976_v61 = vsel %vm911_vm2, %v2494_v4, %v1950_v31 }
  0xb6   : > { %v1943_v33 = vpop.permute.xlu0 %1942  ;;  %v1958_v9 = vpop.permute.xlu1 %1957  ;;  %1737 = vmatpush3.msra.mxu1 %v1042_v56 }
  0xb7   : > { %v1945_v63 = vunpack.i.h.bf16 %v1943_v33  ;;  %v1944_v58 = vunpack.i.l.bf16 %v1943_v33  ;;  %v1960_v38 = vunpack.i.h.bf16 %v1958_v9  ;;  %v1959_v6 = vunpack.i.l.bf16 %v1958_v9 }
  0xb9   : > { %v948_v12 = vsel %vm945_vm4, %v931_v27, %v1944_v58  ;;  %v959_v1 = vsel %vm945_vm4, %v942_v7, %v1945_v63  ;;  %v981_v2 = vsel %vm928_vm3, %v965_v17, %v1959_v6  ;;  %v992_v14 = vsel %vm928_vm3, %v976_v61, %v1960_v38 }
  0xba   : > { %v1953_v18 = vpop.permute.xlu0 %1952  ;;  %1160 = vmatmul.mubr.f32.gmra.mxu0 %v948_v12  ;;  %1215 = vmatmul.mubr.f32.gmra.mxu1 %v959_v1  ;;  %v1968_v19 = vpop.permute.xlu1 %1967 }
  0xbb   : > { %v1970_v44 = vunpack.i.h.bf16 %v1968_v19  ;;  %v1969_v43 = vunpack.i.l.bf16 %v1968_v19  ;;  %v1955_v28 = vunpack.i.h.bf16 %v1953_v18  ;;  %v1954_v4 = vunpack.i.l.bf16 %v1953_v18 }
  0xbd   : > { %v997_v45 = vsel %vm945_vm4, %v981_v2, %v1969_v43  ;;  %v1008_v0 = vsel %vm945_vm4, %v992_v14, %v1970_v44  ;;  %v915_v47 = vsel %vm911_vm2, %v2383_v20, %v1954_v4  ;;  %v926_v31 = vsel %vm911_vm2, %v2397_v26, %v1955_v28 }
  0xbe   : > { %v1963_v50 = vpop.permute.xlu0 %1962  ;;  %v1978_v40 = vpop.permute.xlu1 %1977  ;;  %1164 = vmatprep.mubr.f32.mxu0 %v997_v45  ;;  %1219 = vmatprep.mubr.f32.mxu1 %v1008_v0  ;;  %v3278_v45 = vld [vmem:[#allocation7_spill] sm:$0xff] }
  0xbf   : > { %v1965_v11 = vunpack.i.h.bf16 %v1963_v50  ;;  %v1964_v48 = vunpack.i.l.bf16 %v1963_v50  ;;  %v1980_v57 = vunpack.i.h.bf16 %v1978_v40  ;;  %v1979_v10 = vunpack.i.l.bf16 %v1978_v40 }
  0xc1   : > { %v932_v9 = vsel %vm928_vm3, %v915_v47, %v1964_v48  ;;  %v943_v53 = vsel %vm928_vm3, %v926_v31, %v1965_v11  ;;  %v966_v13 = vsel %vm911_vm2, %v2585_v3, %v1979_v10  ;;  %v977_v55 = vsel %vm911_vm2, %v2761_v32, %v1980_v57  ;;  %v2111_v31 = vld [vmem:[%s2350_s3 + $0x38] sm:$0xff] }
  0xc2   : > { %v1973_v56 = vpop.permute.xlu0 %1972  ;;  %v1988_v15 = vpop.permute.xlu1 %1987 }
  0xc3   : > { %v1975_v42 = vunpack.i.h.bf16 %v1973_v56  ;;  %v1974_v24 = vunpack.i.l.bf16 %v1973_v56  ;;  %v1990_v52 = vunpack.i.h.bf16 %v1988_v15  ;;  %v1989_v33 = vunpack.i.l.bf16 %v1988_v15 }
  0xc5   : > { %v949_v63 = vsel %vm945_vm4, %v932_v9, %v1974_v24  ;;  %v960_v58 = vsel %vm945_vm4, %v943_v53, %v1975_v42  ;;  %v982_v27 = vsel %vm928_vm3, %v966_v13, %v1989_v33  ;;  %v993_v7 = vsel %vm928_vm3, %v977_v55, %v1990_v52 }
  0xc6   : > { %v1983_v20 = vpop.permute.xlu0 %1982  ;;  %1165 = vmatmul.mubr.f32.gmra.mxu0 %v949_v63  ;;  %1220 = vmatmul.mubr.f32.gmra.mxu1 %v960_v58  ;;  %v1998_v26 = vpop.permute.xlu1 %1997 }
  0xc7   : > { %v2000_v38 = vunpack.i.h.bf16 %v1998_v26  ;;  %v1999_v6 = vunpack.i.l.bf16 %v1998_v26  ;;  %v1985_v61 = vunpack.i.h.bf16 %v1983_v20  ;;  %v1984_v32 = vunpack.i.l.bf16 %v1983_v20 }
  0xc9   : > { %v998_v12 = vsel %vm945_vm4, %v982_v27, %v1999_v6  ;;  %v1009_v1 = vsel %vm945_vm4, %v993_v7, %v2000_v38  ;;  %v916_v0 = vsel %vm911_vm2, %v3278_v45, %v1984_v32  ;;  %v927_v50 = vsel %vm911_vm2, %v2416_v35, %v1985_v61 }
  0xca   : > { %v1993_v17 = vpop.permute.xlu0 %1992  ;;  %1169 = vmatprep.mubr.f32.mxu0 %v998_v12  ;;  %1224 = vmatprep.mubr.f32.mxu1 %v1009_v1  ;;  %v2008_v3 = vpop.permute.xlu1 %2007 }
  0xcb   : > { %v1995_v18 = vunpack.i.h.bf16 %v1993_v17  ;;  %v1994_v19 = vunpack.i.l.bf16 %v1993_v17  ;;  %v2010_v40 = vunpack.i.h.bf16 %v2008_v3  ;;  %v2009_v28 = vunpack.i.l.bf16 %v2008_v3  ;;  %v3027_v17 = vld [vmem:[%s2350_s3 + $0x98] sm:$0xff] }
  0xcd   : > { %v933_v4 = vsel %vm928_vm3, %v916_v0, %v1994_v19  ;;  %v944_v11 = vsel %vm928_vm3, %v927_v50, %v1995_v18  ;;  %v967_v35 = vsel %vm911_vm2, %v2779_v16, %v2009_v28  ;;  %v917_v52 = vsel %vm911_vm2, %v2111_v31, %v2010_v40  ;;  %v3280_v50 = vld [vmem:[#allocation9_spill] sm:$0xff]  ;;  %v2116_v31 = vld [vmem:[%s2350_s3 + $0xc8] sm:$0xff] }
  0xce   : > { %v2003_v44 = vpop.permute.xlu0 %2002  ;;  %v2018_v43 = vpop.permute.xlu1 %2017  ;;  %v606_v40 = vrot.slane %v3280_v50, 2 }
  0xcf   : > { %v2005_v2 = vunpack.i.h.bf16 %v2003_v44  ;;  %v2004_v14 = vunpack.i.l.bf16 %v2003_v44  ;;  %v2020_v56 = vunpack.i.h.bf16 %v2018_v43  ;;  %v2019_v15 = vunpack.i.l.bf16 %v2018_v43 }
  0xd1   : > { %v950_v48 = vsel %vm945_vm4, %v933_v4, %v2004_v14  ;;  %v961_v57 = vsel %vm945_vm4, %v944_v11, %v2005_v2 }
  0xd2   : > { %v2013_v10 = vpop.permute.xlu0 %2012  ;;  %1170 = vmatmul.mubr.f32.gmra.mxu0 %v950_v48  ;;  %1225 = vmatmul.mubr.f32.gmra.mxu1 %v961_v57  ;;  %v2028_v42 = vpop.permute.xlu1 %2027  ;;  %v2115_v48 = vld [vmem:[%s2350_s3 + $0xb0] sm:$0xff] }
  0xd3   : > { %v2015_v24 = vunpack.i.h.bf16 %v2013_v10  ;;  %v2014_v47 = vunpack.i.l.bf16 %v2013_v10  ;;  %1738 = vmatprep.mubr.msk.f32.mxu1 %vm911_vm2, %v2523_v22  ;;  %v2030_v16 = vunpack.i.h.bf16 %v2028_v42  ;;  %v2029_v20 = vunpack.i.l.bf16 %v2028_v42 }
  0xd4   : > { %v609_v57 = vrot.slane %v2115_v48, 2 }
  0xd5   : > { %v983_v33 = vsel %vm928_vm3, %v967_v35, %v2014_v47  ;;  %v934_v9 = vsel %vm928_vm3, %v917_v52, %v2015_v24  ;;  %v614_v52 = vrot.slane %v2116_v31, 2 }
  0xd6   : > { %v2023_v53 = vpop.permute.xlu0 %2022  ;;  %1739 = vmatmul.mubr.msk.f32.vlgmr.msra.gmra.mxu1 %vm911_vm2, %v2789_v8  ;;  %v999_v63 = vsel %vm945_vm4, %v983_v33, %v2019_v15  ;;  %v951_v58 = vsel %vm945_vm4, %v934_v9, %v2020_v56  ;;  %v2038_v13 = vpop.permute.xlu1 %2037  ;;  %v3279_v8 = vld [vmem:[#allocation8_spill] sm:$0xff] }
  0xd7   : > { %v2025_v22 = vunpack.i.h.bf16 %v2023_v53  ;;  %v2024_v55 = vunpack.i.l.bf16 %v2023_v53  ;;  %1174 = vmatprep.mubr.f32.mxu0 %v999_v63  ;;  %1741 = vmatprep.mubr.msk.f32.mxu1 %vm911_vm2, %v2682_v37  ;;  %v3023_v37 = vld [vmem:[%s2350_s3 + $0x90] sm:$0xff]  ;;  %v2040_v3 = vunpack.i.h.bf16 %v2038_v13  ;;  %v2039_v61 = vunpack.i.l.bf16 %v2038_v13 }
  0xd8   : > { %1175 = vmatmul.mubr.f32.gmra.mxu0 %v951_v58  ;;  %v603_v1 = vrot.slane %v3023_v37, 2 }
  0xd9   : > { %v968_v26 = vsel %vm911_vm2, %v2733_v29, %v2024_v55  ;;  %v918_v38 = vsel %vm911_vm2, %v3279_v8, %v2025_v22  ;;  %v604_v29 = vrot.slane %v3027_v17, 2  ;;  %v969_v28 = vsel %vm911_vm2, %v2826_v21, %v2039_v61  ;;  %v2117_v8 = vld [vmem:[%s2350_s3 + $0xd0] sm:$0x3] }
  0xda   : > { %v2033_v6 = vpop.permute.xlu0 %2032  ;;  %1742 = vmatmul.mubr.msk.f32.gmra.mxu1 %vm911_vm2, %v2805_v46  ;;  %v2048_v27 = vpop.permute.xlu1 %2047  ;;  %v984_v32 = vsel %vm928_vm3, %v968_v26, %v2029_v20  ;;  %v935_v46 = vsel %vm928_vm3, %v918_v38, %v2030_v16  ;;  %v919_v4 = vsel %vm911_vm2, %v2535_v30, %v2040_v3  ;;  %v611_v30 = vrot.slane %v2888_v36, 2  ;;  %v3281_v16 = vld [vmem:[#allocation6_spill] sm:$0xff] }
  0xdb   : > { %v2035_v7 = vunpack.i.h.bf16 %v2033_v6  ;;  %v2034_v12 = vunpack.i.l.bf16 %v2033_v6  ;;  %1744 = vmatprep.mubr.msk.f32.mxu1 %vm911_vm2, %v2813_v23  ;;  %v2050_v44 = vunpack.i.h.bf16 %v2048_v27  ;;  %v2049_v43 = vunpack.i.l.bf16 %v2048_v27 }
  0xdc   : > { %v605_v0 = vsel %vm304_vm1, %v603_v1, %v604_v29  ;;  %v607_v35 = vsel %vm304_vm1, %v604_v29, %v606_v40  ;;  %v612_v58 = vsel %vm304_vm1, %v609_v57, %v611_v30  ;;  %v3282_v20 = vrot.slane %v3281_v16, 2 }
  0xdd   : > { %v1000_v18 = vsel %vm945_vm4, %v984_v32, %v2034_v12  ;;  %v952_v19 = vsel %vm945_vm4, %v935_v46, %v2035_v7  ;;  %v616_v38 = vrot.slane %v2117_v8, 2  ;;  %v421_v32 = vrot.slane %v3023_v37, 1 }
  0xde   : > { %v2043_v23 = vpop.permute.xlu0 %2042  ;;  %1179 = vmatprep.mubr.f32.mxu0 %v1000_v18  ;;  %1745 = vmatmul.mubr.msk.f32.gmra.mxu1 %vm911_vm2, %v2822_v59  ;;  %v2058_v2 = vpop.permute.xlu1 %2057  ;;  %v2114_v59 = vld [vmem:[%s2350_s3 + $0xa8] sm:$0xff]  ;;  %v615_v26 = vsel %vm304_vm1, %v3282_v20, %v614_v52  ;;  %v422_v46 = vrot.slane %v3027_v17, 1  ;;  %s1375_s3 = sld [smem:[#allocation2]] }
  0xdf   : > { %v2045_v14 = vunpack.i.h.bf16 %v2043_v23  ;;  %v2044_v45 = vunpack.i.l.bf16 %v2043_v23  ;;  %1180 = vmatmul.mubr.f32.gmra.mxu0 %v952_v19  ;;  %1747 = vmatprep.mubr.msk.f32.mxu1 %vm911_vm2, %v2858_v49  ;;  %v608_v11 = vrot.slane %v2114_v59, 2  ;;  %v2060_v33 = vunpack.i.h.bf16 %v2058_v2 }
  0xe0   : > { %v2059_v9 = vunpack.i.l.bf16 %v2058_v2  ;;  %v617_v23 = vsel %vm304_vm1, %v614_v52, %v616_v38  ;;  %v423_v50 = vsel %vm263_vm0, %v421_v32, %v422_v46 }
  0xe1   : > { %v985_v10 = vsel %vm928_vm3, %v969_v28, %v2044_v45  ;;  %v936_v56 = vsel %vm928_vm3, %v919_v4, %v2045_v14  ;;  %v3283_v4 = vld [vmem:[#allocation10_spill] sm:$0xff] }
  0xe2   : > { %v2053_v49 = vpop.permute.xlu0 %2052  ;;  %1748 = vmatmul.mubr.msk.f32.gmra.mxu1 %vm911_vm2, %v2840_v51  ;;  %v1001_v15 = vsel %vm945_vm4, %v985_v10, %v2049_v43  ;;  %v953_v21 = vsel %vm945_vm4, %v936_v56, %v2050_v44  ;;  %v2068_v42 = vpop.permute.xlu1 %2067  ;;  %v610_v51 = vsel %vm304_vm1, %v608_v11, %v609_v57  ;;  %v424_v59 = vrot.slane %v3283_v4, 1 }
  0xe3   : > { %v2055_v24 = vunpack.i.h.bf16 %v2053_v49  ;;  %v2054_v47 = vunpack.i.l.bf16 %v2053_v49  ;;  %1184 = vmatprep.mubr.f32.mxu0 %v1001_v15  ;;  %1750 = vmatprep.mubr.msk.f32.mxu1 %vm911_vm2, %v605_v0  ;;  %v2069_v6 = vunpack.i.l.bf16 %v2068_v42 }
  0xe4   : > { %1185 = vmatmul.mubr.f32.gmra.mxu0 %v953_v21 }
  0xe5   : > { %v970_v53 = vsel %vm911_vm2, %v2835_v62, %v2054_v47  ;;  %v920_v36 = vsel %vm911_vm2, %v2666_v41, %v2055_v24  ;;  %v2070_v62 = vunpack.i.h.bf16 %v2068_v42  ;;  %v971_v44 = vsel %vm911_vm2, %v2865_v25, %v2069_v6 }
  0xe6   : > { %v2063_v63 = vpop.permute.xlu0 %2062  ;;  %1751 = vmatmul.mubr.msk.f32.gmra.mxu1 %vm911_vm2, %v607_v35  ;;  %v2078_v13 = vpop.permute.xlu1 %2077  ;;  %v986_v41 = vsel %vm928_vm3, %v970_v53, %v2059_v9  ;;  %v937_v27 = vsel %vm928_vm3, %v920_v36, %v2060_v33  ;;  %v425_v47 = vsel %vm263_vm0, %v422_v46, %v424_v59 }
  0xe7   : > { %v2065_v22 = vunpack.i.h.bf16 %v2063_v63  ;;  %v2064_v55 = vunpack.i.l.bf16 %v2063_v63  ;;  %1753 = vmatprep.mubr.msk.f32.mxu1 %vm911_vm2, %v610_v51  ;;  %v2080_v29 = vunpack.i.h.bf16 %v2078_v13  ;;  %v2079_v3 = vunpack.i.l.bf16 %v2078_v13 }
  0xe8   : > { %v921_v43 = vsel %vm911_vm2, %v2673_v54, %v2070_v62 }
  0xe9   : > { %v1002_v7 = vsel %vm945_vm4, %v986_v41, %v2064_v55  ;;  %v954_v12 = vsel %vm945_vm4, %v937_v27, %v2065_v22 }
  0xea   : > { %v2073_v1 = vpop.permute.xlu0 %2072  ;;  %1189 = vmatprep.mubr.f32.mxu0 %v1002_v7  ;;  %1754 = vmatmul.mubr.msk.f32.gmra.mxu1 %vm911_vm2, %v612_v58  ;;  %v2088_v61 = vpop.permute.xlu1 %2087 }
  0xeb   : > { %v2075_v18 = vunpack.i.h.bf16 %v2073_v1  ;;  %v2074_v19 = vunpack.i.l.bf16 %v2073_v1  ;;  %1190 = vmatmul.mubr.f32.gmra.mxu0 %v954_v12  ;;  %1756 = vmatprep.mubr.msk.f32.mxu1 %vm911_vm2, %v615_v26  ;;  %v2090_v54 = vunpack.i.h.bf16 %v2088_v61  ;;  %v2089_v25 = vunpack.i.l.bf16 %v2088_v61  ;;  %v3127_v61 = vld [vmem:[%s3259_s2] ss:$0 sm:$0xff] }
  0xed   : > { %v987_v2 = vsel %vm928_vm3, %v971_v44, %v2074_v19  ;;  %v938_v14 = vsel %vm928_vm3, %v921_v43, %v2075_v18  ;;  %v3132_v44 = vstv %s1375_s3  ;;  %s2215_s3 = smov [#allocation3]  }
  0xee   : > { %v2083_v37 = vpop.permute.xlu0 %2082  ;;  %1757 = vmatmul.mubr.msk.f32.gmra.mxu1 %vm911_vm2, %v617_v23  ;;  %v1003_v17 = vsel %vm945_vm4, %v987_v2, %v2079_v3  ;;  %v955_v45 = vsel %vm945_vm4, %v938_v14, %v2080_v29  ;;  %v2098_v0 = vpop.permute.xlu1 %2097  ;;  %s2122_s6 = sshll.u32 %s2215_s3, 4  ;;  %s2123_s6 = int_to_ptr.vmem [resolvable:$false] %s2122_s6 }
  0xef   : > { %v2085_v40 = vunpack.i.h.bf16 %v2083_v37  ;;  %v2084_v28 = vunpack.i.l.bf16 %v2083_v37  ;;  %1194 = vmatprep.mubr.f32.mxu0 %v1003_v17  ;;  %1759 = vmatprep.mubr.msk.f32.mxu1 %vm911_vm2, %v2881_v5  ;;  %v2100_v15 = vunpack.i.h.bf16 %v2098_v0  ;;  %v2099_v21 = vunpack.i.l.bf16 %v2098_v0  ;;  %s2124_s7 = scalar_lea.vmem %s2123_s6, 4096  ;;  %p2125_p2 = scmp.lt.s32.totalorder %s3201_s12, %s2123_s6 }
  0xf0   : > { %1195 = vmatmul.mubr.f32.gmra.mxu0 %v955_v45  ;;  %p2126_p4 = scmp.lt.s32.totalorder %s2124_s7, %s2118_s16 }
  0xf1   : > { %v972_v11 = vsel %vm911_vm2, %v423_v50, %v2084_v28  ;;  %v922_v48 = vsel %vm911_vm2, %v2801_v60, %v2085_v40  ;;  %v973_v33 = vsel %vm911_vm2, %v425_v47, %v2099_v21  ;;  %v923_v9 = vsel %vm911_vm2, %v2688_v39, %v2100_v15 }
  0xf2   : > { %v2093_v57 = vpop.permute.xlu0 %2092  ;;  %1760 = vmatmul.mubr.msk.f32.gmra.mxu1 %vm911_vm2, %v2885_v34  ;;  %v2108_v49 = vpop.permute.xlu1 %2107  ;;  %v988_v5 = vsel %vm928_vm3, %v972_v11, %v2089_v25  ;;  %v939_v42 = vsel %vm928_vm3, %v922_v48, %v2090_v54  ;;  %p2127_p5 = por %p2126_p4, %p2125_p2 }
  0xf3   : > { %v2095_v10 = vunpack.i.h.bf16 %v2093_v57  ;;  %v2094_v56 = vunpack.i.l.bf16 %v2093_v57  ;;  %v2110_v35 = vunpack.i.h.bf16 %v2108_v49  ;;  %v2109_v31 = vunpack.i.l.bf16 %v2108_v49 }
  0xf4   : > { %p2128_p6 = pnand %p2127_p5, %p2121_p1 }
  0xf5   : > { %v1004_v30 = vsel %vm945_vm4, %v988_v5, %v2094_v56  ;;  %v956_v24 = vsel %vm945_vm4, %v939_v42, %v2095_v10 }
  0xf6   : > { %v2103_v60 = vpop.permute.xlu0 %2102  ;;  %1199 = vmatprep.mubr.f32.mxu0 %v1004_v30 }
  0xf7   : > { %v2105_v34 = vunpack.i.h.bf16 %v2103_v60  ;;  %v2104_v52 = vunpack.i.l.bf16 %v2103_v60  ;;  %1200 = vmatmul.mubr.f32.gmra.mxu0 %v956_v24 }
  0xf9   : > { %v989_v51 = vsel %vm928_vm3, %v973_v33, %v2104_v52  ;;  %v940_v53 = vsel %vm928_vm3, %v923_v9, %v2105_v34 }
  0xfa   : > { %v1005_v36 = vsel %vm945_vm4, %v989_v51, %v2109_v31  ;;  %v957_v63 = vsel %vm945_vm4, %v940_v53, %v2110_v35 }
  0xfb   : > { %1204 = vmatprep.mubr.f32.mxu0 %v1005_v36 }
  0xfc   : > { %1205 = vmatmul.mubr.f32.gmra.mxu0 %v957_v63 }
 0x164   : > { %v1662_v58 = vpop.f32.mrf.mxu0 }
 0x166   : > { %v1663_v13 = vpop.f32.mrf.mxu0 }
 0x167   : > { %v1664_v29 = vadd.f32 %v1663_v13, %v1662_v58 }
 0x169   : > { %v1152_v2 = vadd.f32 %v1664_v29, %v3127_v61 }
 0x16e   : > { %v1665_v22 = vpop.f32.mrf.mxu0  ;;  %v3107_v55 = vpop.f32.mrf.mxu1 }
 0x170   : > { %v1666_v16 = vpop.f32.mrf.mxu0  ;;  %v3109_v20 = vpop.f32.mrf.mxu1 }
 0x171   : > { %v1667_v7 = vadd.f32 %v1666_v16, %v1665_v22 }
 0x173   : > { %v1157_v32 = vadd.f32 %v1667_v7, %v3127_v61 }
 0x17a   : > { %v1668_v39 = vpop.f32.mrf.mxu0  ;;  %v3111_v26 = vpop.f32.mrf.mxu1 }
 0x17c   : > { %v1669_v8 = vpop.f32.mrf.mxu0  ;;  %v3113_v38 = vpop.f32.mrf.mxu1 }
 0x17d   : > { %v1670_v46 = vadd.f32 %v1669_v8, %v1668_v39 }
 0x17f   : > { %v1162_v54 = vadd.f32 %v1670_v46, %v3127_v61 }
 0x186   : > { %v1671_v62 = vpop.f32.mrf.mxu0  ;;  %v3115_v6 = vpop.f32.mrf.mxu1 }
 0x188   : > { %v1672_v41 = vpop.f32.mrf.mxu0  ;;  %v3117_v27 = vpop.f32.mrf.mxu1 }
 0x189   : > { %v1673_v18 = vadd.f32 %v1672_v41, %v1671_v62  ;;  %v1703_v41 = vadd.f32 %v3113_v38, %v3111_v26  ;;  %v1706_v26 = vadd.f32 %v3117_v27, %v3115_v6 }
 0x18b   : > { %v1167_v40 = vadd.f32 %v1673_v18, %v3127_v61 }
 0x192   : > { %v1674_v12 = vpop.f32.mrf.mxu0  ;;  %v3119_v1 = vpop.f32.mrf.mxu1 }
 0x194   : > { %v3122_v3 = vpop.f32.mrf.mxu1  ;;  %v1675_v19 = vpop.f32.mrf.mxu0 }
 0x195   : > { %v1676_v0 = vadd.f32 %v1675_v19, %v1674_v12  ;;  %v1709_v38 = vadd.f32 %v3122_v3, %v3119_v1 }
 0x196   : > { %v1740_v23 = vpop.f32.mrf.mxu1 }
 0x197   : > { %v1302_v43 = vadd.f32 %v1740_v23, %v1157_v32  ;;  %v1172_v30 = vadd.f32 %v1676_v0, %v3127_v61  ;;  %v1700_v32 = vadd.f32 %v3109_v20, %v3107_v55  ;;  %v1227_v1 = vadd.f32 %v1709_v38, %v3127_v61 }
 0x198   : > { %v1677_v14 = vpop.f32.mrf.mxu0  ;;  %v1296_v37 = vpop.f32.mrf.mxu1 }
 0x199   : > { %vm1377_vm5 = vcmp.gt.f32.partialorder %v1302_v43, 0.0  ;;  %v1394_v17 = vmul.f32 %v3132_v44, %v1302_v43  ;;  %v1297_v45 = vadd.f32 %v1296_v37, %v1152_v2  ;;  %v1217_v2 = vadd.f32 %v1703_v41, %v3127_v61 }
 0x19a   : > { %v1678_v50 = vpop.f32.mrf.mxu0  ;;  %v1743_v28 = vpop.f32.mrf.mxu1 }
 0x19b   : > { %v1410_v25 = vsel %vm1377_vm5, %v1302_v43, %v1394_v17  ;;  %vm1376_vm6 = vcmp.gt.f32.partialorder %v1297_v45, 0.0  ;;  %v1393_v4 = vmul.f32 %v3132_v44, %v1297_v45  ;;  %v1679_v59 = vadd.f32 %v1678_v50, %v1677_v14 }
 0x19c   : > { %1426 = vst [vmem:[%s3139_s9 + $0x8] sm:$0xff] %v1410_v25  ;;  %v1312_v11 = vadd.f32 %v1743_v28, %v1167_v40  ;;  %v1306_v48 = vpop.f32.mrf.mxu1  ;;  %v1212_v17 = vadd.f32 %v1700_v32, %v3127_v61 }
 0x19d   : > { %v1409_v57 = vsel %vm1376_vm6, %v1297_v45, %v1393_v4  ;;  %v1307_v10 = vadd.f32 %v1306_v48, %v1162_v54  ;;  %v1177_v56 = vadd.f32 %v1679_v59, %v3127_v61  ;;  %v1222_v54 = vadd.f32 %v1706_v26, %v3127_v61 }
 0x19e   : > { %1425 = vst [vmem:[%s3139_s9] sm:$0xff] %v1409_v57  ;;  %vm1379_vm7 = vcmp.gt.f32.partialorder %v1312_v11, 0.0  ;;  %v1396_v49 = vmul.f32 %v3132_v44, %v1312_v11  ;;  %v1746_v15 = vpop.f32.mrf.mxu1 }
 0x19f   : > { %vm1378_vm8 = vcmp.gt.f32.partialorder %v1307_v10, 0.0  ;;  %v1395_v21 = vmul.f32 %v3132_v44, %v1307_v10  ;;  %v1322_v5 = vadd.f32 %v1746_v15, %v1177_v56  ;;  %v1680_v42 = vpop.f32.mrf.mxu0 }
 0x1a0   : > { %v1412_v24 = vsel %vm1379_vm7, %v1312_v11, %v1396_v49  ;;  %v1316_v47 = vpop.f32.mrf.mxu1 }
 0x1a1   : > { %1428 = vst [vmem:[%s3139_s9 + $0x18] sm:$0xff] %v1412_v24  ;;  %v1411_v60 = vsel %vm1378_vm8, %v1307_v10, %v1395_v21  ;;  %vm1381_vm9 = vcmp.gt.f32.partialorder %v1322_v5, 0.0  ;;  %v1398_v35 = vmul.f32 %v3132_v44, %v1322_v5  ;;  %v1317_v31 = vadd.f32 %v1316_v47, %v1172_v30  ;;  %v1681_v34 = vpop.f32.mrf.mxu0 }
 0x1a2   : > { %1427 = vst [vmem:[%s3139_s9 + $0x10] sm:$0xff] %v1411_v60  ;;  %v1682_v52 = vadd.f32 %v1681_v34, %v1680_v42  ;;  %v1749_v33 = vpop.f32.mrf.mxu1 }
 0x1a3   : > { %v1414_v9 = vsel %vm1381_vm9, %v1322_v5, %v1398_v35  ;;  %vm1380_vm10 = vcmp.gt.f32.partialorder %v1317_v31, 0.0  ;;  %v1397_v51 = vmul.f32 %v3132_v44, %v1317_v31 }
 0x1a4   : > { %1430 = vst [vmem:[%s3139_s9 + $0x28] sm:$0xff] %v1414_v9  ;;  %v1683_v53 = vpop.f32.mrf.mxu0  ;;  %v1182_v36 = vadd.f32 %v1682_v52, %v3127_v61  ;;  %v1326_v63 = vpop.f32.mrf.mxu1 }
 0x1a5   : > { %v1413_v58 = vsel %vm1380_vm10, %v1317_v31, %v1397_v51 }
 0x1a6   : > { %1429 = vst [vmem:[%s3139_s9 + $0x20] sm:$0xff] %v1413_v58  ;;  %v1327_v13 = vadd.f32 %v1326_v63, %v1182_v36  ;;  %v1684_v22 = vpop.f32.mrf.mxu0  ;;  %v1752_v16 = vpop.f32.mrf.mxu1 }
 0x1a7   : > { %v1685_v39 = vadd.f32 %v1684_v22, %v1683_v53 }
 0x1a8   : > { %vm1382_vm11 = vcmp.gt.f32.partialorder %v1327_v13, 0.0  ;;  %v1399_v8 = vmul.f32 %v3132_v44, %v1327_v13  ;;  %v1336_v62 = vpop.f32.mrf.mxu1 }
 0x1a9   : > { %v1187_v7 = vadd.f32 %v1685_v39, %v3127_v61 }
 0x1aa   : > { %v1415_v12 = vsel %vm1382_vm11, %v1327_v13, %v1399_v8  ;;  %v3158_v29 = vpop.f32.mrf.mxu1 }
 0x1ab   : > { %1431 = vst [vmem:[%s3139_s9 + $0x30] sm:$0xff] %v1415_v12  ;;  %v1332_v46 = vadd.f32 %v1749_v33, %v1187_v7  ;;  %v1686_v18 = vpop.f32.mrf.mxu0 }
 0x1ac   : > { %v1346_v19 = vpop.f32.mrf.mxu1 }
 0x1ad   : > { %vm1383_vm12 = vcmp.gt.f32.partialorder %v1332_v46, 0.0  ;;  %v1400_v23 = vmul.f32 %v3132_v44, %v1332_v46  ;;  %v1687_v43 = vpop.f32.mrf.mxu0 }
 0x1ae   : > { %v1688_v14 = vadd.f32 %v1687_v43, %v1686_v18  ;;  %v1758_v37 = vpop.f32.mrf.mxu1 }
 0x1af   : > { %v1416_v55 = vsel %vm1383_vm12, %v1332_v46, %v1400_v23  ;;  %v1362_v20 = vadd.f32 %v1758_v37, %v1217_v2 }
 0x1b0   : > { %1432 = vst [vmem:[%s3139_s9 + $0x38] sm:$0xff] %v1416_v55  ;;  %v1192_v45 = vadd.f32 %v1688_v14, %v3127_v61  ;;  %v1689_v0 = vpop.f32.mrf.mxu0  ;;  %v1356_v50 = vpop.f32.mrf.mxu1 }
 0x1b1   : > { %vm1389_vm13 = vcmp.gt.f32.partialorder %v1362_v20, 0.0  ;;  %v1406_v40 = vmul.f32 %v3132_v44, %v1362_v20  ;;  %v1357_v28 = vadd.f32 %v1356_v50, %v1212_v17 }
 0x1b2   : > { %v1337_v6 = vadd.f32 %v1336_v62, %v1192_v45  ;;  %v1690_v27 = vpop.f32.mrf.mxu0  ;;  %v1761_v3 = vpop.f32.mrf.mxu1 }
 0x1b3   : > { %v1422_v25 = vsel %vm1389_vm13, %v1362_v20, %v1406_v40  ;;  %vm1388_vm14 = vcmp.gt.f32.partialorder %v1357_v28, 0.0  ;;  %v1405_v4 = vmul.f32 %v3132_v44, %v1357_v28  ;;  %v1691_v59 = vadd.f32 %v1690_v27, %v1689_v0 }
 0x1b4   : > { %vm1384_vm15 = vcmp.gt.f32.partialorder %v1337_v6, 0.0  ;;  %v1401_v11 = vmul.f32 %v3132_v44, %v1337_v6  ;;  %1438 = vst [vmem:[%s3139_s9 + $0x68] sm:$0xff] %v1422_v25  ;;  %v1372_v48 = vadd.f32 %v1761_v3, %v1227_v1  ;;  %v1366_v57 = vpop.f32.mrf.mxu1 }
 0x1b5   : > { %v1421_v10 = vsel %vm1388_vm14, %v1357_v28, %v1405_v4  ;;  %v1197_v56 = vadd.f32 %v1691_v59, %v3127_v61  ;;  %v1367_v49 = vadd.f32 %v1366_v57, %v1222_v54 }
 0x1b6   : > { %v1417_v15 = vsel %vm1384_vm15, %v1337_v6, %v1401_v11  ;;  %1437 = vst [vmem:[%s3139_s9 + $0x60] sm:$0xff] %v1421_v10  ;;  %vm1391_vm0 = vcmp.gt.f32.partialorder %v1372_v48, 0.0  ;;  %v1408_v21 = vmul.f32 %v3132_v44, %v1372_v48 }
 0x1b7   : > { %1433 = vst [vmem:[%s3139_s9 + $0x40] sm:$0xff] %v1417_v15  ;;  %v1342_v5 = vadd.f32 %v1752_v16, %v1197_v56  ;;  %vm1390_vm1 = vcmp.gt.f32.partialorder %v1367_v49, 0.0  ;;  %v1407_v42 = vmul.f32 %v3132_v44, %v1367_v49  ;;  %v1692_v30 = vpop.f32.mrf.mxu0 }
 0x1b8   : > { %v1424_v24 = vsel %vm1391_vm0, %v1372_v48, %v1408_v21 }
 0x1b9   : > { %vm1385_vm2 = vcmp.gt.f32.partialorder %v1342_v5, 0.0  ;;  %v1402_v47 = vmul.f32 %v3132_v44, %v1342_v5  ;;  %1440 = vst [vmem:[%s3139_s9 + $0x78] sm:$0xff] %v1424_v24  ;;  %v1423_v60 = vsel %vm1390_vm1, %v1367_v49, %v1407_v42  ;;  %v1693_v35 = vpop.f32.mrf.mxu0 }
 0x1ba   : > { %1439 = vst [vmem:[%s3139_s9 + $0x70] sm:$0xff] %v1423_v60  ;;  %v1694_v31 = vadd.f32 %v1693_v35, %v1692_v30 }
 0x1bb   : > { %v1418_v34 = vsel %vm1385_vm2, %v1342_v5, %v1402_v47 }
 0x1bc   : > { %1434 = vst [vmem:[%s3139_s9 + $0x48] sm:$0xff] %v1418_v34  ;;  %v1202_v52 = vadd.f32 %v1694_v31, %v3127_v61  ;;  %v1695_v33 = vpop.f32.mrf.mxu0 }
 0x1be   : > { %v1347_v9 = vadd.f32 %v1346_v19, %v1202_v52  ;;  %v1696_v51 = vpop.f32.mrf.mxu0 }
 0x1bf   : > { %v1697_v53 = vadd.f32 %v1696_v51, %v1695_v33 }
 0x1c0   : > { %vm1386_vm3 = vcmp.gt.f32.partialorder %v1347_v9, 0.0  ;;  %v1403_v36 = vmul.f32 %v3132_v44, %v1347_v9 }
 0x1c1   : > { %v1207_v63 = vadd.f32 %v1697_v53, %v3127_v61 }
 0x1c2   : > { %v1419_v58 = vsel %vm1386_vm3, %v1347_v9, %v1403_v36 }
 0x1c3   : > { %1435 = vst [vmem:[%s3139_s9 + $0x50] sm:$0xff] %v1419_v58  ;;  %v1352_v13 = vadd.f32 %v3158_v29, %v1207_v63 }
 0x1c5   : > { %vm1387_vm4 = vcmp.gt.f32.partialorder %v1352_v13, 0.0  ;;  %v1404_v22 = vmul.f32 %v3132_v44, %v1352_v13 }
 0x1c7   : > { %v1420_v61 = vsel %vm1387_vm4, %v1352_v13, %v1404_v22 }
 0x1c8   : > { %1436 = vst [vmem:[%s3139_s9 + $0x58] sm:$0xff] %v1420_v61 }
 0x1c9   : > { %2131 = shalt.err (!%p2128_p6)
}
 0x1ca   : > { %s2132_s25 = scalar_lea.hbm %s3199_s14, 2048  ;;  %s2136_s5 = scalar_lea.hbm %s3261_s4, 8192 }
 0x1cb   : > { %p2133_p7 = scmp.ne.s32.totalorder %s3199_s14, %s2132_s25  ;;  %p2137_p11 = scmp.lt.s32.totalorder %s3199_s14, %s3261_s4 }
 0x1cc   : > { %p2138_p12 = scmp.lt.s32.totalorder %s2136_s5, %s2132_s25 }
 0x1cd   : > { %p2134_p9 = pnand %p2133_p7, %p2297_p3 }
 0x1ce   : > { %p2139_p13 = por %p2138_p12, %p2137_p11 }
 0x1cf   : > { %p2135_p10 = pneg %p2134_p9 }
 0x1d1   : > { %p2140_p0 = pnand %p2139_p13, %p2135_p10 }
 0x1d3   : > { %2143 = shalt.err (!%p2140_p0)
}
 0x1d4   : > { %s2216_s11 = smov 128   ;;  %s2217_s20 = smov 8  }
 0x1d5   : > { %1795 = dma.vmem_to_hbm [thread:$0]  (%p2297_p3), %s3201_s12, 2048, %s3199_s14, %s3206_s15, %s2216_s11, %s2216_s11, %s2217_s20  }
 0x1d6 PF: > { %p1801_p1 = scmp.ge.s32.totalorder %s2210_s24, 2  ;;  %s1473_s21 = sand.u32 1, %s2182_s17  }
 0x1d7   : > { %s1474_s16 = scalar_lea.sflag [#allocation4], %s1473_s21 }
 0x1d8   : > { %p1798_p2 = pnand %p1801_p1, %p2306_p8 }
 0x1da   : > { %p1799_p4 = pneg %p1798_p2 }
 0x1dc   : > { %2177 = dma.done.wait (%p1799_p4), %s1474_s16, 2048  }
 0x1dd   : > { %2179 = vsyncadd (%p1799_p4), %s1474_s16, 4294965248  ;;  %s18_s24 = sadd.s32 1, %s2210_s24   ;;  %s3284_s17 = smov %s2186_s18 }
 0x1de   : > { %p15_p5 = scmp.ge.s32.totalorder %s18_s24, 6   ;;  %s3285_s18 = smov %s2190_s19 }
 0x1df   : > { %s3286_s19 = smov %s2315_s8  ;;  %s3287_s20 = smov %s2202_s22 }
 0x1e0   : > { %s3288_s21 = smov %s2206_s23  ;;  %s3289_s22 = smov %s3292_s26 }
 0x1e1   : > { %s3290_s23 = smov %s3296_s27  ;;  %17 = sbr.rel (!%p15_p5) target bundleno = 7 (0x7), region = 74 }
 0x1e6   :  { %1479 = vsyncpa [#allocation4], 1 }
 0x1e7   :  { %1481 = vsyncpa [#allocation4 + $0x1], 1 }

</bundles_post_ra>
